<compile_context>
chip_gen: v6e
topology: v6e:2x2x1
jax: 0.10.0
libtpu: 0.0.40
codegen_flags: <defaults>
</compile_context>

<pallas_src>
import jax
import jax.numpy as jnp
from jax import lax
from jax.experimental import pallas as pl
from jax.experimental.pallas import tpu as pltpu

LANE = 128
SUBLANE = 8


def _round_up(n, m):
    return (n + m - 1) // m * m


def _vmem_limit_bytes():
    """Physical-VMEM-aware scoped limit with ~25% headroom (cap 100 MiB)."""
    default = 64 * 1024 * 1024
    try:
        cap = getattr(pltpu.get_tpu_info(), "vmem_capacity_bytes", None)
    except Exception:
        cap = None
    if not cap:
        return default
    return int(min(cap * 3 // 4, 100 * 1024 * 1024))


def qrnn_fused_kernel(x_ref, w_ref, b_ref, out_ref, cn_ref,
                      fz_s, g_s, o_s, cseq_s):
    """One grid step == one QRNN layer (sequential grid axis over layers).

    x_ref:   (S*Bp, Pin)   zero-padded input sequence (read only at layer 0)
    w_ref:   (P, 3*Hp)     this layer's weight; Z/F/O chunks 128-lane aligned
    b_ref:   (1, 3*Hp)     this layer's bias (same padded layout)
    out_ref: (S*Bp, Hp)    VMEM-resident across layers; ALSO the inter-layer
                           activation carry (model dtype)
    cn_ref:  (Bp, Hp)      this layer's final cell state
    fz_s/g_s/o_s/cseq_s:   (S*Bp, Hp) f32 scratch
    """
    layer = pl.program_id(0)
    Hp = fz_s.shape[-1]
    Bp = cn_ref.shape[0]
    S = fz_s.shape[0] // Bp
    Pin = x_ref.shape[-1]

    bias = b_ref[0, :].astype(jnp.float32)

    def emit_gates(y):
        # Single fused pass over the (S*Bp, 3*Hp) matmul result: emit exactly
        # the quantities the recurrence / output pass need, nothing rewritten.
        z = jnp.tanh(y[:, :Hp])
        f = jax.nn.sigmoid(y[:, Hp:2 * Hp])
        fz_s[...] = f * z                       # f_t * z_t   (off serial path)
        g_s[...] = 1.0 - f                      # 1 - f_t     (off serial path)
        o_s[...] = jax.nn.sigmoid(y[:, 2 * Hp:])

    # ---- fused Linear on the MXU (f32 accumulation, model-dtype operands) ----
    @pl.when(layer == 0)
    def _():
        y = jnp.dot(x_ref[...], w_ref[:Pin, :],
                    preferred_element_type=jnp.float32) + bias
        emit_gates(y)

    @pl.when(layer > 0)
    def _():
        # Previous layer's output lives in the resident out_ref block.
        y = jnp.dot(out_ref[...], w_ref[:Hp, :],
                    preferred_element_type=jnp.float32) + bias
        emit_gates(y)

    # ---- serial ForgetMult: ONLY c_t = fz_t + g_t * c_{t-1} in the loop ----
    # hidden=None in the reference -> c_0 = 0 gives c_1 = f_1 * z_1 exactly.
    def step(t, c_prev):
        r = pl.multiple_of(t * Bp, Bp)          # Bp % 8 == 0 -> aligned tiles
        c_new = fz_s[pl.ds(r, Bp), :] + g_s[pl.ds(r, Bp), :] * c_prev
        cseq_s[pl.ds(r, Bp), :] = c_new
        return c_new

    c_last = lax.fori_loop(0, S, step,
                           jnp.zeros((Bp, Hp), jnp.float32),
                           unroll=min(8, S))

    # ---- output gate hoisted off the serial path: one bulk lane-dense pass ----
    h = o_s[...] * cseq_s[...]
    out_ref[...] = h.astype(out_ref.dtype)      # next layer's input / final out
    cn_ref[...] = c_last.astype(cn_ref.dtype)


def qrnn_forward(x, params, hidden_size):
    """Multi-layer QRNN forward with a single fused Pallas kernel.

    x: (S, B, input_size); params: list of (W^T (d_in, 3H), b (1, 3H)) per layer.
    Returns (output (S, B, H), h_n (L, B, H))  [h_n = final cell state per layer].
    """
    S, B, Din = x.shape
    L = len(params)
    H = hidden_size
    dt = x.dtype

    Hp = _round_up(H, LANE)
    Pin = _round_up(Din, LANE)
    P = max(Pin, Hp)
    Bp = _round_up(B, SUBLANE)   # every timestep starts on an 8-row boundary

    # ---- pack inputs / parameters into lane-aligned, model-dtype layouts ----
    x_p = jnp.zeros((S, Bp, Pin), dt).at[:, :B, :Din].set(x.astype(dt))
    x2 = x_p.reshape(S * Bp, Pin)

    w_stack = jnp.zeros((L, P, 3 * Hp), dt)
    b_stack = jnp.zeros((L, 1, 3 * Hp), dt)
    for l, (w, b) in enumerate(params):
        d_in = w.shape[0]
        for g in range(3):  # Z, F, O chunks each start at a 128-lane boundary
            w_stack = w_stack.at[l, :d_in, g * Hp:g * Hp + H].set(
                w[:, g * H:(g + 1) * H].astype(dt))
            b_stack = b_stack.at[l, 0, g * Hp:g * Hp + H].set(
                b[0, g * H:(g + 1) * H].astype(dt))
    # Invariant: padded gate columns get y=0 -> z=0, f=o=0.5 -> padded c/h stay
    # exactly 0, and weight rows >= d_in are zero, so padding never leaks
    # between layers or into the sliced-out results.

    itemsize = jnp.dtype(dt).itemsize
    cost = pl.CostEstimate(
        flops=2 * S * Bp * (Pin * 3 * Hp + max(L - 1, 0) * Hp * 3 * Hp),
        transcendentals=3 * L * S * Bp * Hp,
        bytes_accessed=(x2.size + w_stack.size + b_stack.size
                        + S * Bp * Hp + L * Bp * Hp) * itemsize,
    )

    out_p, cn_p = pl.pallas_call(
        qrnn_fused_kernel,
        out_shape=(
            jax.ShapeDtypeStruct((S * Bp, Hp), dt),
            jax.ShapeDtypeStruct((L, Bp, Hp), dt),
        ),
        grid_spec=pltpu.PrefetchScalarGridSpec(
            num_scalar_prefetch=0,
            grid=(L,),
            in_specs=[
                pl.BlockSpec((S * Bp, Pin), lambda l: (0, 0)),        # x (layer 0)
                pl.BlockSpec((None, P, 3 * Hp), lambda l: (l, 0, 0)),  # W per layer
                pl.BlockSpec((None, 1, 3 * Hp), lambda l: (l, 0, 0)),  # b per layer
            ],
            out_specs=(
                pl.BlockSpec((S * Bp, Hp), lambda l: (0, 0)),          # resident out/carry
                pl.BlockSpec((None, Bp, Hp), lambda l: (l, 0, 0)),     # c_T per layer
            ),
            scratch_shapes=[
                pltpu.VMEM((S * Bp, Hp), jnp.float32),   # fz = f*z
                pltpu.VMEM((S * Bp, Hp), jnp.float32),   # g  = 1-f
                pltpu.VMEM((S * Bp, Hp), jnp.float32),   # o
                pltpu.VMEM((S * Bp, Hp), jnp.float32),   # cell sequence
            ],
        ),
        compiler_params=pltpu.CompilerParams(
            dimension_semantics=("arbitrary",),          # layers are sequential
            vmem_limit_bytes=_vmem_limit_bytes(),
        ),
        cost_estimate=cost,
    )(x2, w_stack, b_stack)

    out = out_p.reshape(S, Bp, Hp)[:, :B, :H]
    h_n = cn_p[:, :B, :H]
    return out, h_n


def init_qrnn_params(key, input_size, hidden_size, num_layers):
    """nn.Linear-style init: U(-1/sqrt(fan_in), 1/sqrt(fan_in)).
    Weights stored transposed as (in_features, 3*hidden)."""
    params = []
    for l in range(num_layers):
        d_in = input_size if l == 0 else hidden_size
        key, kw, kb = jax.random.split(key, 3)
        bound = 1.0 / (d_in ** 0.5)
        w = jax.random.uniform(kw, (d_in, 3 * hidden_size),
                               minval=-bound, maxval=bound, dtype=jnp.float32)
        b = jax.random.uniform(kb, (1, 3 * hidden_size),
                               minval=-bound, maxval=bound, dtype=jnp.float32)
        params.append((w, b))
    return params


def qrnn_forward_ref(x, params):
    """Pure-JAX reference for correctness checking."""
    h_n = []
    for (w, b) in params:
        S, B, _ = x.shape
        Hd = w.shape[1] // 3
        y = x @ w + b[0]
        z = jnp.tanh(y[:, :, :Hd])
        f = jax.nn.sigmoid(y[:, :, Hd:2 * Hd])
        o = jax.nn.sigmoid(y[:, :, 2 * Hd:])

        def step(c, zfo):
            z_t, f_t, o_t = zfo
            c_new = f_t * z_t + (1.0 - f_t) * c
            return c_new, o_t * c_new

        c_last, h = lax.scan(step, jnp.zeros((B, Hd), x.dtype), (z, f, o))
        x = h
        h_n.append(c_last)
    return x, jnp.stack(h_n, axis=0)


if __name__ == "__main__":
    seq_len, batch, input_size, hidden_size, num_layers = 8, 2, 32, 32, 2

    key = jax.random.PRNGKey(0)
    key, kx = jax.random.split(key)
    x = jax.random.normal(kx, (seq_len, batch, input_size), dtype=jnp.float32)
    params = init_qrnn_params(key, input_size, hidden_size, num_layers)

    out, h_n = qrnn_forward(x, params, hidden_size)
    out = jax.block_until_ready(out)
    h_n = jax.block_until_ready(h_n)

    assert out.shape == (seq_len, batch, hidden_size)
    assert h_n.shape == (num_layers, batch, hidden_size)

    # sanity check against pure-JAX reference
    out_ref, h_n_ref = qrnn_forward_ref(x, params)
    assert jnp.allclose(out, out_ref, atol=1e-4, rtol=1e-4)
    assert jnp.allclose(h_n, h_n_ref, atol=1e-4, rtol=1e-4)

    print("KERNEL_OK")
</pallas_src>

<mosaic_0001>
module attributes {stable_mosaic.version = 11 : i64} {
  func.func @qrnn_fused_kernel(%arg0: i32, %arg1: memref<64x128xf32, #tpu.memory_space<vmem>>, %arg2: memref<1x128x384xf32, #tpu.memory_space<vmem>>, %arg3: memref<1x1x384xf32, #tpu.memory_space<vmem>>, %arg4: memref<64x128xf32, #tpu.memory_space<vmem>>, %arg5: memref<1x8x128xf32, #tpu.memory_space<vmem>>, %arg6: memref<64x128xf32, #tpu.memory_space<vmem>>, %arg7: memref<64x128xf32, #tpu.memory_space<vmem>>, %arg8: memref<64x128xf32, #tpu.memory_space<vmem>>, %arg9: memref<64x128xf32, #tpu.memory_space<vmem>>) attributes {dimension_semantics = [#tpu.dimension_semantics<arbitrary>], iteration_bounds = array<i64: 2>, scalar_prefetch = 0 : i64, scratch_operands = 4 : i64, tpu.core_type = #tpu.core_type<tc>, window_params = [{pipeline_mode = #tpu.pipeline_mode<synchronous>, transform_indices = @transform_0, window_bounds = array<i64: 64, 128>}, {transform_indices = @transform_1, window_bounds = array<i64: 1, 128, 384>}, {transform_indices = @transform_2, window_bounds = array<i64: 1, 1, 384>}, {pipeline_mode = #tpu.pipeline_mode<synchronous>, transform_indices = @transform_3, window_bounds = array<i64: 64, 128>}, {transform_indices = @transform_4, window_bounds = array<i64: 1, 8, 128>}]} {
    %c0 = arith.constant 0 : index
    %c0_0 = arith.constant 0 : index
    %c0_1 = arith.constant 0 : index
    %0 = vector.load %arg3[%c0, %c0_0, %c0_1] : memref<1x1x384xf32, #tpu.memory_space<vmem>>, vector<1x1x384xf32>
    %1 = vector.shape_cast %0 : vector<1x1x384xf32> to vector<384xf32>
    %c0_i32 = arith.constant 0 : i32
    %2 = arith.cmpi eq, %arg0, %c0_i32 : i32
    %3 = arith.extui %2 : i1 to i32
    %c0_i32_2 = arith.constant 0 : i32
    %4 = arith.cmpi ne, %3, %c0_i32_2 : i32
    scf.if %4 {
      %c0_47 = arith.constant 0 : index
      %c0_48 = arith.constant 0 : index
      %96 = vector.load %arg1[%c0_47, %c0_48] : memref<64x128xf32, #tpu.memory_space<vmem>>, vector<64x128xf32>
      %c0_49 = arith.constant 0 : index
      %c0_50 = arith.constant 0 : index
      %c0_51 = arith.constant 0 : index
      %97 = vector.load %arg2[%c0_49, %c0_50, %c0_51] : memref<1x128x384xf32, #tpu.memory_space<vmem>>, vector<1x128x384xf32>
      %98 = vector.shape_cast %97 : vector<1x128x384xf32> to vector<128x384xf32>
      %cst_52 = arith.constant dense<0.000000e+00> : vector<64x384xf32>
      %99 = tpu.matmul %96, %98, %cst_52 {dimension_numbers = #tpu.dot_dimension_numbers<[1], [0], [0], [1], [0, 0, 1, 1], [], []>} : vector<64x128xf32>, vector<128x384xf32>, vector<64x384xf32> -> vector<64x384xf32>
      %100 = vector.shape_cast %1 : vector<384xf32> to vector<1x384xf32>
      %101 = vector.broadcast %100 : vector<1x384xf32> to vector<64x384xf32>
      %102 = arith.addf %99, %101 : vector<64x384xf32>
      %103 = vector.extract_strided_slice %102 {offsets = [0, 0], sizes = [64, 128], strides = [1, 1]} : vector<64x384xf32> to vector<64x128xf32>
      %104 = math.tanh %103 : vector<64x128xf32>
      %105 = vector.extract_strided_slice %102 {offsets = [0, 128], sizes = [64, 128], strides = [1, 1]} : vector<64x384xf32> to vector<64x128xf32>
      %106 = arith.negf %105 : vector<64x128xf32>
      %107 = math.exp %106 : vector<64x128xf32>
      %cst_53 = arith.constant 1.000000e+00 : f32
      %108 = vector.broadcast %cst_53 : f32 to vector<64x128xf32>
      %109 = arith.addf %108, %107 : vector<64x128xf32>
      %110 = arith.divf %108, %109 : vector<64x128xf32>
      %111 = arith.mulf %110, %104 : vector<64x128xf32>
      %c0_54 = arith.constant 0 : index
      %c0_55 = arith.constant 0 : index
      %112 = vector.load %arg6[%c0_54, %c0_55] : memref<64x128xf32, #tpu.memory_space<vmem>>, vector<64x128xf32>
      tpu.vector_store %arg6[%c0_54, %c0_55], %111 {strides = array<i32>} : memref<64x128xf32, #tpu.memory_space<vmem>>, vector<64x128xf32>,
      %cst_56 = arith.constant 1.000000e+00 : f32
      %113 = vector.broadcast %cst_56 : f32 to vector<64x128xf32>
      %114 = arith.subf %113, %110 : vector<64x128xf32>
      %c0_57 = arith.constant 0 : index
      %c0_58 = arith.constant 0 : index
      %115 = vector.load %arg7[%c0_57, %c0_58] : memref<64x128xf32, #tpu.memory_space<vmem>>, vector<64x128xf32>
      tpu.vector_store %arg7[%c0_57, %c0_58], %114 {strides = array<i32>} : memref<64x128xf32, #tpu.memory_space<vmem>>, vector<64x128xf32>,
      %116 = vector.extract_strided_slice %102 {offsets = [0, 256], sizes = [64, 128], strides = [1, 1]} : vector<64x384xf32> to vector<64x128xf32>
      %117 = arith.negf %116 : vector<64x128xf32>
      %118 = math.exp %117 : vector<64x128xf32>
      %cst_59 = arith.constant 1.000000e+00 : f32
      %119 = vector.broadcast %cst_59 : f32 to vector<64x128xf32>
      %120 = arith.addf %119, %118 : vector<64x128xf32>
      %121 = arith.divf %119, %120 : vector<64x128xf32>
      %c0_60 = arith.constant 0 : index
      %c0_61 = arith.constant 0 : index
      %122 = vector.load %arg8[%c0_60, %c0_61] : memref<64x128xf32, #tpu.memory_space<vmem>>, vector<64x128xf32>
      tpu.vector_store %arg8[%c0_60, %c0_61], %121 {strides = array<i32>} : memref<64x128xf32, #tpu.memory_space<vmem>>, vector<64x128xf32>,
    } else {
    }
    %c0_i32_3 = arith.constant 0 : i32
    %5 = arith.cmpi sgt, %arg0, %c0_i32_3 : i32
    %6 = arith.extui %5 : i1 to i32
    %c0_i32_4 = arith.constant 0 : i32
    %7 = arith.cmpi ne, %6, %c0_i32_4 : i32
    scf.if %7 {
      %c0_47 = arith.constant 0 : index
      %c0_48 = arith.constant 0 : index
      %96 = vector.load %arg4[%c0_47, %c0_48] : memref<64x128xf32, #tpu.memory_space<vmem>>, vector<64x128xf32>
      %c0_49 = arith.constant 0 : index
      %c0_50 = arith.constant 0 : index
      %c0_51 = arith.constant 0 : index
      %97 = vector.load %arg2[%c0_49, %c0_50, %c0_51] : memref<1x128x384xf32, #tpu.memory_space<vmem>>, vector<1x128x384xf32>
      %98 = vector.shape_cast %97 : vector<1x128x384xf32> to vector<128x384xf32>
      %cst_52 = arith.constant dense<0.000000e+00> : vector<64x384xf32>
      %99 = tpu.matmul %96, %98, %cst_52 {dimension_numbers = #tpu.dot_dimension_numbers<[1], [0], [0], [1], [0, 0, 1, 1], [], []>} : vector<64x128xf32>, vector<128x384xf32>, vector<64x384xf32> -> vector<64x384xf32>
      %100 = vector.shape_cast %1 : vector<384xf32> to vector<1x384xf32>
      %101 = vector.broadcast %100 : vector<1x384xf32> to vector<64x384xf32>
      %102 = arith.addf %99, %101 : vector<64x384xf32>
      %103 = vector.extract_strided_slice %102 {offsets = [0, 0], sizes = [64, 128], strides = [1, 1]} : vector<64x384xf32> to vector<64x128xf32>
      %104 = math.tanh %103 : vector<64x128xf32>
      %105 = vector.extract_strided_slice %102 {offsets = [0, 128], sizes = [64, 128], strides = [1, 1]} : vector<64x384xf32> to vector<64x128xf32>
      %106 = arith.negf %105 : vector<64x128xf32>
      %107 = math.exp %106 : vector<64x128xf32>
      %cst_53 = arith.constant 1.000000e+00 : f32
      %108 = vector.broadcast %cst_53 : f32 to vector<64x128xf32>
      %109 = arith.addf %108, %107 : vector<64x128xf32>
      %110 = arith.divf %108, %109 : vector<64x128xf32>
      %111 = arith.mulf %110, %104 : vector<64x128xf32>
      %c0_54 = arith.constant 0 : index
      %c0_55 = arith.constant 0 : index
      %112 = vector.load %arg6[%c0_54, %c0_55] : memref<64x128xf32, #tpu.memory_space<vmem>>, vector<64x128xf32>
      tpu.vector_store %arg6[%c0_54, %c0_55], %111 {strides = array<i32>} : memref<64x128xf32, #tpu.memory_space<vmem>>, vector<64x128xf32>,
      %cst_56 = arith.constant 1.000000e+00 : f32
      %113 = vector.broadcast %cst_56 : f32 to vector<64x128xf32>
      %114 = arith.subf %113, %110 : vector<64x128xf32>
      %c0_57 = arith.constant 0 : index
      %c0_58 = arith.constant 0 : index
      %115 = vector.load %arg7[%c0_57, %c0_58] : memref<64x128xf32, #tpu.memory_space<vmem>>, vector<64x128xf32>
      tpu.vector_store %arg7[%c0_57, %c0_58], %114 {strides = array<i32>} : memref<64x128xf32, #tpu.memory_space<vmem>>, vector<64x128xf32>,
      %116 = vector.extract_strided_slice %102 {offsets = [0, 256], sizes = [64, 128], strides = [1, 1]} : vector<64x384xf32> to vector<64x128xf32>
      %117 = arith.negf %116 : vector<64x128xf32>
      %118 = math.exp %117 : vector<64x128xf32>
      %cst_59 = arith.constant 1.000000e+00 : f32
      %119 = vector.broadcast %cst_59 : f32 to vector<64x128xf32>
      %120 = arith.addf %119, %118 : vector<64x128xf32>
      %121 = arith.divf %119, %120 : vector<64x128xf32>
      %c0_60 = arith.constant 0 : index
      %c0_61 = arith.constant 0 : index
      %122 = vector.load %arg8[%c0_60, %c0_61] : memref<64x128xf32, #tpu.memory_space<vmem>>, vector<64x128xf32>
      tpu.vector_store %arg8[%c0_60, %c0_61], %121 {strides = array<i32>} : memref<64x128xf32, #tpu.memory_space<vmem>>, vector<64x128xf32>,
    } else {
    }
    %cst = arith.constant 0.000000e+00 : f32
    %8 = vector.broadcast %cst : f32 to vector<8x128xf32>
    %c0_i32_5 = arith.constant 0 : i32
    %c8_i32 = arith.constant 8 : i32
    %9 = arith.muli %c0_i32_5, %c8_i32 : i32
    %10 = tpu.assume_multiple %9, 8 : i32
    %11 = arith.index_cast %10 : i32 to index
    %c0_6 = arith.constant 0 : index
    %12 = vector.load %arg6[%11, %c0_6] : memref<64x128xf32, #tpu.memory_space<vmem>>, vector<8x128xf32>
    %13 = arith.index_cast %10 : i32 to index
    %c0_7 = arith.constant 0 : index
    %14 = vector.load %arg7[%13, %c0_7] : memref<64x128xf32, #tpu.memory_space<vmem>>, vector<8x128xf32>
    %15 = arith.mulf %14, %8 : vector<8x128xf32>
    %16 = arith.addf %12, %15 : vector<8x128xf32>
    %17 = arith.index_cast %10 : i32 to index
    %c0_8 = arith.constant 0 : index
    %18 = vector.load %arg9[%17, %c0_8] : memref<64x128xf32, #tpu.memory_space<vmem>>, vector<8x128xf32>
    tpu.vector_store %arg9[%17, %c0_8], %16 {strides = array<i32>} : memref<64x128xf32, #tpu.memory_space<vmem>>, vector<8x128xf32>,
    %c1_i32 = arith.constant 1 : i32
    %c8_i32_9 = arith.constant 8 : i32
    %19 = arith.muli %c1_i32, %c8_i32_9 : i32
    %20 = tpu.assume_multiple %19, 8 : i32
    %21 = arith.index_cast %20 : i32 to index
    %c0_10 = arith.constant 0 : index
    %22 = vector.load %arg6[%21, %c0_10] : memref<64x128xf32, #tpu.memory_space<vmem>>, vector<8x128xf32>
    %23 = arith.index_cast %20 : i32 to index
    %c0_11 = arith.constant 0 : index
    %24 = vector.load %arg7[%23, %c0_11] : memref<64x128xf32, #tpu.memory_space<vmem>>, vector<8x128xf32>
    %25 = arith.mulf %24, %16 : vector<8x128xf32>
    %26 = arith.addf %22, %25 : vector<8x128xf32>
    %27 = arith.index_cast %20 : i32 to index
    %c0_12 = arith.constant 0 : index
    %28 = vector.load %arg9[%27, %c0_12] : memref<64x128xf32, #tpu.memory_space<vmem>>, vector<8x128xf32>
    tpu.vector_store %arg9[%27, %c0_12], %26 {strides = array<i32>} : memref<64x128xf32, #tpu.memory_space<vmem>>, vector<8x128xf32>,
    %c2_i32 = arith.constant 2 : i32
    %c8_i32_13 = arith.constant 8 : i32
    %29 = arith.muli %c2_i32, %c8_i32_13 : i32
    %30 = tpu.assume_multiple %29, 8 : i32
    %31 = arith.index_cast %30 : i32 to index
    %c0_14 = arith.constant 0 : index
    %32 = vector.load %arg6[%31, %c0_14] : memref<64x128xf32, #tpu.memory_space<vmem>>, vector<8x128xf32>
    %33 = arith.index_cast %30 : i32 to index
    %c0_15 = arith.constant 0 : index
    %34 = vector.load %arg7[%33, %c0_15] : memref<64x128xf32, #tpu.memory_space<vmem>>, vector<8x128xf32>
    %35 = arith.mulf %34, %26 : vector<8x128xf32>
    %36 = arith.addf %32, %35 : vector<8x128xf32>
    %37 = arith.index_cast %30 : i32 to index
    %c0_16 = arith.constant 0 : index
    %38 = vector.load %arg9[%37, %c0_16] : memref<64x128xf32, #tpu.memory_space<vmem>>, vector<8x128xf32>
    tpu.vector_store %arg9[%37, %c0_16], %36 {strides = array<i32>} : memref<64x128xf32, #tpu.memory_space<vmem>>, vector<8x128xf32>,
    %c3_i32 = arith.constant 3 : i32
    %c8_i32_17 = arith.constant 8 : i32
    %39 = arith.muli %c3_i32, %c8_i32_17 : i32
    %40 = tpu.assume_multiple %39, 8 : i32
    %41 = arith.index_cast %40 : i32 to index
    %c0_18 = arith.constant 0 : index
    %42 = vector.load %arg6[%41, %c0_18] : memref<64x128xf32, #tpu.memory_space<vmem>>, vector<8x128xf32>
    %43 = arith.index_cast %40 : i32 to index
    %c0_19 = arith.constant 0 : index
    %44 = vector.load %arg7[%43, %c0_19] : memref<64x128xf32, #tpu.memory_space<vmem>>, vector<8x128xf32>
    %45 = arith.mulf %44, %36 : vector<8x128xf32>
    %46 = arith.addf %42, %45 : vector<8x128xf32>
    %47 = arith.index_cast %40 : i32 to index
    %c0_20 = arith.constant 0 : index
    %48 = vector.load %arg9[%47, %c0_20] : memref<64x128xf32, #tpu.memory_space<vmem>>, vector<8x128xf32>
    tpu.vector_store %arg9[%47, %c0_20], %46 {strides = array<i32>} : memref<64x128xf32, #tpu.memory_space<vmem>>, vector<8x128xf32>,
    %c4_i32 = arith.constant 4 : i32
    %c8_i32_21 = arith.constant 8 : i32
    %49 = arith.muli %c4_i32, %c8_i32_21 : i32
    %50 = tpu.assume_multiple %49, 8 : i32
    %51 = arith.index_cast %50 : i32 to index
    %c0_22 = arith.constant 0 : index
    %52 = vector.load %arg6[%51, %c0_22] : memref<64x128xf32, #tpu.memory_space<vmem>>, vector<8x128xf32>
    %53 = arith.index_cast %50 : i32 to index
    %c0_23 = arith.constant 0 : index
    %54 = vector.load %arg7[%53, %c0_23] : memref<64x128xf32, #tpu.memory_space<vmem>>, vector<8x128xf32>
    %55 = arith.mulf %54, %46 : vector<8x128xf32>
    %56 = arith.addf %52, %55 : vector<8x128xf32>
    %57 = arith.index_cast %50 : i32 to index
    %c0_24 = arith.constant 0 : index
    %58 = vector.load %arg9[%57, %c0_24] : memref<64x128xf32, #tpu.memory_space<vmem>>, vector<8x128xf32>
    tpu.vector_store %arg9[%57, %c0_24], %56 {strides = array<i32>} : memref<64x128xf32, #tpu.memory_space<vmem>>, vector<8x128xf32>,
    %c5_i32 = arith.constant 5 : i32
    %c8_i32_25 = arith.constant 8 : i32
    %59 = arith.muli %c5_i32, %c8_i32_25 : i32
    %60 = tpu.assume_multiple %59, 8 : i32
    %61 = arith.index_cast %60 : i32 to index
    %c0_26 = arith.constant 0 : index
    %62 = vector.load %arg6[%61, %c0_26] : memref<64x128xf32, #tpu.memory_space<vmem>>, vector<8x128xf32>
    %63 = arith.index_cast %60 : i32 to index
    %c0_27 = arith.constant 0 : index
    %64 = vector.load %arg7[%63, %c0_27] : memref<64x128xf32, #tpu.memory_space<vmem>>, vector<8x128xf32>
    %65 = arith.mulf %64, %56 : vector<8x128xf32>
    %66 = arith.addf %62, %65 : vector<8x128xf32>
    %67 = arith.index_cast %60 : i32 to index
    %c0_28 = arith.constant 0 : index
    %68 = vector.load %arg9[%67, %c0_28] : memref<64x128xf32, #tpu.memory_space<vmem>>, vector<8x128xf32>
    tpu.vector_store %arg9[%67, %c0_28], %66 {strides = array<i32>} : memref<64x128xf32, #tpu.memory_space<vmem>>, vector<8x128xf32>,
    %c6_i32 = arith.constant 6 : i32
    %c8_i32_29 = arith.constant 8 : i32
    %69 = arith.muli %c6_i32, %c8_i32_29 : i32
    %70 = tpu.assume_multiple %69, 8 : i32
    %71 = arith.index_cast %70 : i32 to index
    %c0_30 = arith.constant 0 : index
    %72 = vector.load %arg6[%71, %c0_30] : memref<64x128xf32, #tpu.memory_space<vmem>>, vector<8x128xf32>
    %73 = arith.index_cast %70 : i32 to index
    %c0_31 = arith.constant 0 : index
    %74 = vector.load %arg7[%73, %c0_31] : memref<64x128xf32, #tpu.memory_space<vmem>>, vector<8x128xf32>
    %75 = arith.mulf %74, %66 : vector<8x128xf32>
    %76 = arith.addf %72, %75 : vector<8x128xf32>
    %77 = arith.index_cast %70 : i32 to index
    %c0_32 = arith.constant 0 : index
    %78 = vector.load %arg9[%77, %c0_32] : memref<64x128xf32, #tpu.memory_space<vmem>>, vector<8x128xf32>
    tpu.vector_store %arg9[%77, %c0_32], %76 {strides = array<i32>} : memref<64x128xf32, #tpu.memory_space<vmem>>, vector<8x128xf32>,
    %c7_i32 = arith.constant 7 : i32
    %c8_i32_33 = arith.constant 8 : i32
    %79 = arith.muli %c7_i32, %c8_i32_33 : i32
    %80 = tpu.assume_multiple %79, 8 : i32
    %81 = arith.index_cast %80 : i32 to index
    %c0_34 = arith.constant 0 : index
    %82 = vector.load %arg6[%81, %c0_34] : memref<64x128xf32, #tpu.memory_space<vmem>>, vector<8x128xf32>
    %83 = arith.index_cast %80 : i32 to index
    %c0_35 = arith.constant 0 : index
    %84 = vector.load %arg7[%83, %c0_35] : memref<64x128xf32, #tpu.memory_space<vmem>>, vector<8x128xf32>
    %85 = arith.mulf %84, %76 : vector<8x128xf32>
    %86 = arith.addf %82, %85 : vector<8x128xf32>
    %87 = arith.index_cast %80 : i32 to index
    %c0_36 = arith.constant 0 : index
    %88 = vector.load %arg9[%87, %c0_36] : memref<64x128xf32, #tpu.memory_space<vmem>>, vector<8x128xf32>
    tpu.vector_store %arg9[%87, %c0_36], %86 {strides = array<i32>} : memref<64x128xf32, #tpu.memory_space<vmem>>, vector<8x128xf32>,
    %c8_i32_37 = arith.constant 8 : i32
    %c0_38 = arith.constant 0 : index
    %c0_39 = arith.constant 0 : index
    %89 = vector.load %arg8[%c0_38, %c0_39] : memref<64x128xf32, #tpu.memory_space<vmem>>, vector<64x128xf32>
    %c0_40 = arith.constant 0 : index
    %c0_41 = arith.constant 0 : index
    %90 = vector.load %arg9[%c0_40, %c0_41] : memref<64x128xf32, #tpu.memory_space<vmem>>, vector<64x128xf32>
    %91 = arith.mulf %89, %90 : vector<64x128xf32>
    %c0_42 = arith.constant 0 : index
    %c0_43 = arith.constant 0 : index
    %92 = vector.load %arg4[%c0_42, %c0_43] : memref<64x128xf32, #tpu.memory_space<vmem>>, vector<64x128xf32>
    tpu.vector_store %arg4[%c0_42, %c0_43], %91 {strides = array<i32>} : memref<64x128xf32, #tpu.memory_space<vmem>>, vector<64x128xf32>,
    %c0_44 = arith.constant 0 : index
    %c0_45 = arith.constant 0 : index
    %c0_46 = arith.constant 0 : index
    %93 = vector.load %arg5[%c0_44, %c0_45, %c0_46] : memref<1x8x128xf32, #tpu.memory_space<vmem>>, vector<1x8x128xf32>
    %94 = vector.shape_cast %93 : vector<1x8x128xf32> to vector<8x128xf32>
    %95 = vector.shape_cast %86 : vector<8x128xf32> to vector<1x8x128xf32>
    tpu.vector_store %arg5[%c0_44, %c0_45, %c0_46], %95 {strides = array<i32>} : memref<1x8x128xf32, #tpu.memory_space<vmem>>, vector<1x8x128xf32>,
    return
  }
  func.func @transform_0(%arg0: i32) -> (i32, i32) {
    %c0_i32 = arith.constant 0 : i32
    %c0_i32_0 = arith.constant 0 : i32
    %c0_i32_1 = arith.constant 0 : i32
    return %c0_i32, %c0_i32_0 : i32, i32
  }
  func.func @transform_1(%arg0: i32) -> (i32, i32, i32) {
    %c0_i32 = arith.constant 0 : i32
    %c0_i32_0 = arith.constant 0 : i32
    %c0_i32_1 = arith.constant 0 : i32
    return %arg0, %c0_i32, %c0_i32_0 : i32, i32, i32
  }
  func.func @transform_2(%arg0: i32) -> (i32, i32, i32) {
    %c0_i32 = arith.constant 0 : i32
    %c0_i32_0 = arith.constant 0 : i32
    %c0_i32_1 = arith.constant 0 : i32
    return %arg0, %c0_i32, %c0_i32_0 : i32, i32, i32
  }
  func.func @transform_3(%arg0: i32) -> (i32, i32) {
    %c0_i32 = arith.constant 0 : i32
    %c0_i32_0 = arith.constant 0 : i32
    %c0_i32_1 = arith.constant 0 : i32
    return %c0_i32, %c0_i32_0 : i32, i32
  }
  func.func @transform_4(%arg0: i32) -> (i32, i32, i32) {
    %c0_i32 = arith.constant 0 : i32
    %c0_i32_0 = arith.constant 0 : i32
    %c0_i32_1 = arith.constant 0 : i32
    return %arg0, %c0_i32, %c0_i32_0 : i32, i32, i32
  }
}

</mosaic_0001>

<bundles_post_ra>
// kernel: tpu_custom_call.1
= control target key start
LH: loop header
LB: loop body
LE: loop exit
PB: predicated region body
PF: predicated region fallthrough
CT: control target
= control target key end

     0   :  { %s2481_s0 = inlined_call_operand.hbm [shape: f32[64,128], index: 0, kind: input, shape index: {}]   ;;  %s2482_s1 = inlined_call_operand.hbm [shape: f32[2,128,384], index: 1, kind: input, shape index: {}]   ;;  %s2483_s2 = inlined_call_operand.hbm [shape: f32[2,1,384], index: 2, kind: input, shape index: {}]   ;;  %s2484_s3 = inlined_call_operand.hbm [shape: f32[64,128], index: 3, kind: output, shape index: {0}]   ;;  %s2485_s4 = inlined_call_operand.hbm [shape: f32[2,8,128], index: 4, kind: output, shape index: {1}]  }
   0x1   :  { %2491 = sst [smem:[#allocation19_spill]] %s2482_s1 }
   0x2   :  { %10 = vsyncpa [#allocation7], 0 }
   0x3   :  { %11 = vsyncpa [#allocation10], 0 }
   0x4   :  { %13 = vsyncpa [#allocation10 + $0x1], 0 }
   0x5   :  { %14 = vsyncpa [#allocation8], 0 }
   0x6   :  { %15 = vsyncpa [#allocation14], 0 }
   0x7   :  { %17 = vsyncpa [#allocation14 + $0x1], 0  ;;  %s2024_s15 = smov 0   ;;  %s2026_s16 = smov 0  }
   0x8   :  { %s2028_s17 = smov 0   ;;  %s2030_s18 = smov 0  }
   0x9 LB: > { %s2045_s19 = sadd.s32 1, %s1984_s18   ;;  %s51_s20 = sadd.s32 1, %s1980_s17  ;;  %s1984_s18 = sphi %s2030_s18, %s2515_s18   ;;  %s1980_s17 = sphi %s2028_s17, %s2514_s17   ;;  %s1976_s16 = sphi %s2026_s16, %s2513_s16   ;;  %s1972_s15 = sphi %s2024_s15, %s2512_s15  }
   0xa   : > { %s48_s21 = ssub.s32 %s1984_s18, %s2045_s19  ;;  %p58_p0 = scmp.ne.s32.totalorder %s1980_s17, %s1976_s16 }
   0xb   : > { %p49_p1 = scmp.eq.s32.totalorder %s48_s21, 0  ;;  %p59_p2 = scmp.eq.s32.totalorder %s1984_s18, 0 }
   0xc   : > { %p1599_p4 = scmp.lt.s32.totalorder %s1984_s18, 2  ;;  %s174_s23 = sand.u32 1, %s1984_s18  }
   0xd   : > { %s2056_s22 = scalar_select %p49_p1, %s1980_s17, %s51_s20  }
   0xe   : > { %p60_p5 = por %p59_p2, %p58_p0  ;;  %s176_s24 = sand.u32 1, %s1980_s17  }
   0xf   : > { %s1563_s25 = smul.u32 384, %s176_s24  ;;  %s2493_s1 = sld [smem:[#allocation19_spill]] }
  0x10   : > { %p2065_p6 = pnand %p1599_p4, %p60_p5  ;;  %s1564_s27 = smul.u32 6144, %s1984_s18 }
  0x11   : > { %s178_s5 = scalar_lea.vmem [#allocation9], %s1563_s25  ;;  %s2077_s7 = scalar_lea.sflag [#allocation10], %s174_s23 }
  0x12   : > { %s185_s6 = sshll.u32 %s178_s5, 4  ;;  %p2486_p8 = pneg %p2065_p6  ;;  %s2075_s6 = int_to_ptr.vmem [resolvable:$true] %s185_s6 }
  0x15   : > { %s2073_s30 = scalar_lea.hbm %s2493_s1, %s1564_s27  ;;  %s1811_s11 = scalar_lea.hbm %s2493_s1, 12288 }
  0x16   : > { %s1806_s8 = scalar_lea.hbm %s2073_s30, 6144  ;;  %p1812_p11 = scmp.lt.s32.totalorder %s2073_s30, %s2493_s1 }
  0x17   : > { %p1807_p7 = scmp.ne.s32.totalorder %s2073_s30, %s1806_s8  ;;  %p1813_p12 = scmp.lt.s32.totalorder %s1811_s11, %s1806_s8 }
  0x19   : > { %p1809_p9 = pnand %p2486_p8, %p1807_p7  ;;  %p1814_p13 = por %p1813_p12, %p1812_p11 }
  0x1b   : > { %p1810_p10 = pneg %p1809_p9 }
  0x1d   : > { %p1815_p1 = pnand %p1814_p13, %p1810_p10 }
  0x1f   : > { %1818 = shalt.err (!%p1815_p1)
}
  0x20   : > { %s1819_s14 = scalar_lea.vmem %s2075_s6, 6144  ;;  %s1986_s20 = smov [#allocation9]  }
  0x21   : > { %p1820_p2 = scmp.ne.s32.totalorder %s2075_s6, %s1819_s14  ;;  %s1824_s21 = sshll.u32 %s1986_s20, 4  ;;  %s1825_s21 = int_to_ptr.vmem [resolvable:$false] %s1824_s21 }
  0x22   : > { %s1826_s23 = scalar_lea.vmem %s1825_s21, 12288  ;;  %p1827_p7 = scmp.lt.s32.totalorder %s2075_s6, %s1825_s21 }
  0x23   : > { %p1822_p4 = pnand %p1820_p2, %p2486_p8  ;;  %p1828_p9 = scmp.lt.s32.totalorder %s1826_s23, %s1819_s14 }
  0x25   : > { %p1823_p5 = pneg %p1822_p4  ;;  %p1829_p3 = por %p1828_p9, %p1827_p7 }
  0x27   : > { %p1830_p11 = pnand %p1829_p3, %p1823_p5 }
  0x29   : > { %1833 = shalt.err (!%p1830_p11)
}
  0x2a   : > { %s1987_s25 = smov 384   ;;  %s1988_s27 = smov 24  }
  0x2b   : > { %1590 = dma.hbm_to_vmem [thread:$0]  (!%p2065_p6), %s2073_s30, 6144, %s2075_s6, %s2077_s7, %s1987_s25, %s1987_s25, %s1988_s27  }
  0x2c   : > { %s2105_s28 = sadd.s32 4294967295, %s1984_s18   ;;  %s1378_s29 = sadd.s32 4294967294, %s1984_s18  }
  0x2d   : > { %p64_p3 = scmp.ne.s32.totalorder %s1976_s16, %s1972_s15  ;;  %p2488_p10 = scmp.eq.s32.totalorder %s2105_s28, 0 }
  0x2e   : > { %p2487_p12 = scmp.eq.s32.totalorder %s2105_s28, 1  ;;  %p141_p13 = scmp.eq.s32.totalorder %s1378_s29, 1 }
  0x2f   : > { %p2114_p1 = por %p2488_p10, %p64_p3  ;;  %p1379_p2 = scmp.ge.s32.totalorder %s1984_s18, 1 }
  0x30   : > { %p2124_p4 = por %p2487_p12, %p58_p0  ;;  %p2128_p5 = por %p141_p13, %p64_p3 }
  0x31   : > { %s2494_s5 = scalar_select %p2114_p1, 1, 0 }
  0x32   : > { %s2495_s30 = scalar_select %p2124_p4, 1, 0 }
  0x33   : > { %s2496_s6 = scalar_select %p2128_p5, 1, 0 }
  0x34   : > { %p148_p7 = scmp.lt.s32.totalorder %s1984_s18, 3  ;;  %s1989_s9 = smov [#allocation6]  }
  0x35   : > { %s160_s10 = sshll.u32 %s1989_s9, 4  ;;  %s1565_s11 = smul.u32 3, %s176_s24  ;;  %s161_s10 = int_to_ptr.vmem [resolvable:$true] %s160_s10 }
  0x36   : > { %p2134_p11 = pnand %p1379_p2, %p148_p7  ;;  %s1566_s12 = smul.u32 48, %s1984_s18 }
  0x37   : > { %s199_s23 = scalar_lea.vmem [#allocation11], %s1565_s11  ;;  %s1845_s27 = scalar_lea.vmem %s161_s10, 1024 }
  0x38   : > { %p1583_p8 = pneg %p2134_p11  ;;  %s2152_s21 = scalar_lea.hbm %s2483_s2, %s1566_s12 }
  0x39   : > { %s207_s25 = sshll.u32 %s199_s23, 4  ;;  %p1846_p13 = scmp.ne.s32.totalorder %s161_s10, %s1845_s27  ;;  %s2154_s25 = int_to_ptr.vmem [resolvable:$true] %s207_s25 }
  0x3a   : > { %p2145_p0 = pnand %p1583_p8, %p2488_p10  ;;  %p1853_p8 = scmp.lt.s32.totalorder %s161_s10, %s161_s10 }
  0x3b   : > { %p1854_p12 = scmp.lt.s32.totalorder %s1845_s27, %s1845_s27 }
  0x3c   : > { %p1836_p3 = pneg %p2145_p0 }
  0x3d   : > { %p1855_p9 = por %p1854_p12, %p1853_p8 }
  0x3e   : > { %p1848_p2 = pnand %p1846_p13, %p1836_p3 }
  0x40   : > { %p1849_p7 = pneg %p1848_p2 }
  0x42   : > { %p1856_p10 = pnand %p1855_p9, %p1849_p7 }
  0x44   : > { %1859 = shalt.err (!%p1856_p10)
}
  0x45   : > { %s1990_s24 = smov 128   ;;  %s1991_s29 = smov 8  }
  0x46   : > { %1586 = dma.hbm_to_vmem [thread:$0]  (!%p2145_p0), %s2481_s0, 1024, %s161_s10, [#allocation7], %s1990_s24, %s1990_s24, %s1991_s29  }
  0x47   : > { %s1860_s12 = scalar_lea.hbm %s2152_s21, 48  ;;  %p2499_p13 = pneg %p2065_p6 }
  0x48   : > { %p1861_p3 = scmp.ne.s32.totalorder %s2152_s21, %s1860_s12  ;;  %s1865_s23 = scalar_lea.hbm %s2483_s2, 96 }
  0x49   : > { %p1866_p10 = scmp.lt.s32.totalorder %s2152_s21, %s2483_s2  ;;  %p1867_p9 = scmp.lt.s32.totalorder %s1865_s23, %s1860_s12 }
  0x4a   : > { %p1863_p2 = pnand %p1861_p3, %p2499_p13 }
  0x4b   : > { %p1868_p7 = por %p1867_p9, %p1866_p10 }
  0x4c   : > { %p1864_p12 = pneg %p1863_p2 }
  0x4e   : > { %p1869_p8 = pnand %p1868_p7, %p1864_p12 }
  0x50   : > { %1872 = shalt.err (!%p1869_p8)
}
  0x51   : > { %s1873_s10 = scalar_lea.vmem %s2154_s25, 48  ;;  %p2500_p3 = pmov %p2499_p13 }
  0x52   : > { %p1874_p0 = scmp.ne.s32.totalorder %s2154_s25, %s1873_s10  ;;  %s1992_s13 = smov [#allocation11]  }
  0x53   : > { %s1878_s24 = sshll.u32 %s1992_s13, 4  ;;  %s1879_s24 = int_to_ptr.vmem [resolvable:$false] %s1878_s24 }
  0x54   : > { %p1876_p13 = pnand %p1874_p0, %p2500_p3  ;;  %s1880_s29 = scalar_lea.vmem %s1879_s24, 96 }
  0x55   : > { %p1881_p5 = scmp.lt.s32.totalorder %s2154_s25, %s1879_s24  ;;  %p1882_p4 = scmp.lt.s32.totalorder %s1880_s29, %s1873_s10 }
  0x56   : > { %p1877_p2 = pneg %p1876_p13 }
  0x57   : > { %p1883_p1 = por %p1882_p4, %p1881_p5 }
  0x59   : > { %p1884_p10 = pnand %p1883_p1, %p1877_p2 }
  0x5b   : > { %1887 = shalt.err (!%p1884_p10)
}
  0x5c   : > { %1593 = dma.hbm_to_vmem [thread:$0]  (!%p2065_p6), %s2152_s21, 48, %s2154_s25, %s2077_s7  }
  0x5d   : > { %216 = sbr.rel (%p2134_p11) target bundleno = 780 (0x30c), region = 32  ;;  %p2501_p12 = scmp.eq.s32.totalorder (!%p2134_p11), %s2105_s28, 0 }
  0x62   : > { %1955 = dma.done.wait (%p2501_p12), [#allocation7], 1024   ;;  %p2502_p9 = pmov %p2501_p12 }
  0x63   : > { %s222_s1 = sand.u32 1, %s2105_s28   ;;  %s2194_s9 = sand.u32 1, %s1976_s16  }
  0x64   : > { %1957 = vsyncadd (%p2502_p9), [#allocation7], 4294966272  ;;  %s1567_s26 = smul.u32 384, %s2194_s9  ;;  %s223_s11 = scalar_lea.sflag [#allocation10], %s222_s1 }
  0x65   : > { %p2503_p6 = scmp.ne.s32.totalorder %s2494_s5, 0 }
  0x66   : > { %s2197_s12 = scalar_lea.vmem [#allocation9], %s1567_s26 }
  0x67   : > { %1959 = dma.done.wait (%p2503_p6), %s223_s11, 6192  }
  0x68   : > { %1961 = vsyncadd (%p2503_p6), %s223_s11, 4294961104  ;;  %s1568_s7 = smul.u32 3, %s2194_s9  ;;  %s1386_s8 = sshll.u32 %s2194_s9, 3 }
  0x69   : > { %s2207_s25 = scalar_lea.vmem [#allocation13], %s1386_s8  ;;  %p2504_p1 = scmp.ne.s32.totalorder %s2105_s28, 0 }
  0x6a   : > { %s235_s21 = scalar_lea.vmem [#allocation11], %s1568_s7 }
  0x6b   : > { %v2205_v0 = vld [vmem:[%s235_s21] sm:$0x7]  ;;  %269 = sbr.rel (%p2504_p1) target bundleno = 411 (0x19b), region = 48 }
  0x70   : > { %v324_v1 = vld [vmem:[%s2197_s12 + $0x170] sm:$0xff]  ;;  %v323_v2 = vld [vmem:[%s2197_s12 + $0x168] sm:$0xff]  ;;  %v321_v3 = vld [vmem:[%s2197_s12 + $0x158] sm:$0xff]  ;;  %v1993_v5 = vmov 0.0   ;;  %v327_v58 = vlaneseq }
  0x71   : > { %342 = vmatprep.subr.mxu0 %v324_v1  ;;  %v320_v4 = vld [vmem:[%s2197_s12 + $0x150] sm:$0xff]  ;;  %406 = vmatprep.mubr.f32.mxu0 %v1993_v5  ;;  %v318_v6 = vld [vmem:[%s2197_s12 + $0x140] sm:$0xff]  ;;  %v317_v7 = vld [vmem:[%s2197_s12 + $0x138] sm:$0xff] }
  0x72   : > { %343 = vmatpush1.msra.mxu0 %v323_v2  ;;  %v315_v8 = vld [vmem:[%s2197_s12 + $0x128] sm:$0xff]  ;;  %v314_v9 = vld [vmem:[%s2197_s12 + $0x120] sm:$0xff]  ;;  %v325_v10 = vld [vmem:[%s2197_s12 + $0x178] sm:$0xff]  ;;  %v328_v59 = vshrl.u32 %v327_v58, 7 }
  0x73   : > { %344 = vmatprep.subr.mxu0 %v321_v3  ;;  %v312_v11 = vld [vmem:[%s2197_s12 + $0x110] sm:$0xff]  ;;  %1475 = vmatprep.subr.mxu1 %v325_v10  ;;  %v322_v12 = vld [vmem:[%s2197_s12 + $0x160] sm:$0xff]  ;;  %v311_v13 = vld [vmem:[%s2197_s12 + $0x108] sm:$0xff] }
  0x74   : > { %345 = vmatpush1.msra.mxu0 %v320_v4  ;;  %1476 = vmatpush3.msra.mxu1 %v325_v10  ;;  %v319_v14 = vld [vmem:[%s2197_s12 + $0x148] sm:$0xff]  ;;  %v309_v15 = vld [vmem:[%s2197_s12 + $0xf8] sm:$0xff]  ;;  %v308_v16 = vld [vmem:[%s2197_s12 + $0xf0] sm:$0xff]  ;;  %v333_v60 = vsub.s32 1, %v328_v59  ;;  %v337_v61 = vsub.s32 2, %v328_v59  ;;  %v329_v4 = vsub.s32 0, %v328_v59 }
  0x75   : > { %346 = vmatprep.subr.mxu0 %v318_v6  ;;  %1477 = vmatprep.subr.mxu1 %v322_v12  ;;  %v316_v17 = vld [vmem:[%s2197_s12 + $0x130] sm:$0xff]  ;;  %v306_v18 = vld [vmem:[%s2197_s12 + $0xe0] sm:$0xff]  ;;  %v305_v19 = vld [vmem:[%s2197_s12 + $0xd8] sm:$0xff] }
  0x76   : > { %347 = vmatpush1.msra.mxu0 %v317_v7  ;;  %1478 = vmatpush3.msra.mxu1 %v322_v12  ;;  %v313_v20 = vld [vmem:[%s2197_s12 + $0x118] sm:$0xff]  ;;  %v303_v21 = vld [vmem:[%s2197_s12 + $0xc8] sm:$0xff]  ;;  %v302_v22 = vld [vmem:[%s2197_s12 + $0xc0] sm:$0xff]  ;;  %v2268_v62 = vrot.slane %v2205_v0, %v333_v60  ;;  %v2271_v2 = vrot.slane %v2205_v0, %v337_v61  ;;  %v2277_v12 = vrot.slane %v2205_v0, %v329_v4 }
  0x77   : > { %348 = vmatprep.subr.mxu0 %v315_v8  ;;  %1479 = vmatprep.subr.mxu1 %v319_v14  ;;  %v310_v23 = vld [vmem:[%s2197_s12 + $0x100] sm:$0xff]  ;;  %v300_v24 = vld [vmem:[%s2197_s12 + $0xb0] sm:$0xff]  ;;  %v299_v25 = vld [vmem:[%s2197_s12 + $0xa8] sm:$0xff] }
  0x78   : > { %349 = vmatpush1.msra.mxu0 %v314_v9  ;;  %1480 = vmatpush3.msra.mxu1 %v319_v14  ;;  %v307_v26 = vld [vmem:[%s2197_s12 + $0xe8] sm:$0xff]  ;;  %v297_v27 = vld [vmem:[%s2197_s12 + $0x98] sm:$0xff]  ;;  %v296_v28 = vld [vmem:[%s2197_s12 + $0x90] sm:$0xff] }
  0x79   : > { %350 = vmatprep.subr.mxu0 %v312_v11  ;;  %1481 = vmatprep.subr.mxu1 %v316_v17  ;;  %v304_v29 = vld [vmem:[%s2197_s12 + $0xd0] sm:$0xff]  ;;  %v294_v30 = vld [vmem:[%s2197_s12 + $0x80] sm:$0xff]  ;;  %v293_v31 = vld [vmem:[%s2197_s12 + $0x78] sm:$0xff] }
  0x7a   : > { %351 = vmatpush1.msra.mxu0 %v311_v13  ;;  %1482 = vmatpush3.msra.mxu1 %v316_v17  ;;  %v301_v32 = vld [vmem:[%s2197_s12 + $0xb8] sm:$0xff]  ;;  %v291_v33 = vld [vmem:[%s2197_s12 + $0x68] sm:$0xff]  ;;  %v290_v34 = vld [vmem:[%s2197_s12 + $0x60] sm:$0xff] }
  0x7b   : > { %352 = vmatprep.subr.mxu0 %v309_v15  ;;  %1483 = vmatprep.subr.mxu1 %v313_v20  ;;  %v298_v35 = vld [vmem:[%s2197_s12 + $0xa0] sm:$0xff]  ;;  %v288_v36 = vld [vmem:[%s2197_s12 + $0x50] sm:$0xff]  ;;  %v287_v37 = vld [vmem:[%s2197_s12 + $0x48] sm:$0xff] }
  0x7c   : > { %353 = vmatpush1.msra.mxu0 %v308_v16  ;;  %1484 = vmatpush3.msra.mxu1 %v313_v20  ;;  %v295_v38 = vld [vmem:[%s2197_s12 + $0x88] sm:$0xff]  ;;  %v285_v39 = vld [vmem:[%s2197_s12 + $0x38] sm:$0xff]  ;;  %v284_v40 = vld [vmem:[%s2197_s12 + $0x30] sm:$0xff] }
  0x7d   : > { %354 = vmatprep.subr.mxu0 %v306_v18  ;;  %1485 = vmatprep.subr.mxu1 %v310_v23  ;;  %v292_v41 = vld [vmem:[%s2197_s12 + $0x70] sm:$0xff]  ;;  %v282_v42 = vld [vmem:[%s2197_s12 + $0x20] sm:$0xff]  ;;  %v281_v43 = vld [vmem:[%s2197_s12 + $0x18] sm:$0xff] }
  0x7e   : > { %355 = vmatpush1.msra.mxu0 %v305_v19  ;;  %1486 = vmatpush3.msra.mxu1 %v310_v23  ;;  %v289_v44 = vld [vmem:[%s2197_s12 + $0x58] sm:$0xff]  ;;  %v279_v45 = vld [vmem:[%s2197_s12 + $0x8] sm:$0xff]  ;;  %v278_v46 = vld [vmem:[%s2197_s12] sm:$0xff] }
  0x7f   : > { %356 = vmatprep.subr.mxu0 %v303_v21  ;;  %1487 = vmatprep.subr.mxu1 %v307_v26  ;;  %v286_v47 = vld [vmem:[%s2197_s12 + $0x40] sm:$0xff]  ;;  %v283_v49 = vld [vmem:[%s2197_s12 + $0x28] sm:$0xff]  ;;  %v280_v50 = vld [vmem:[%s2197_s12 + $0x10] sm:$0xff] }
  0x80   : > { %357 = vmatpush1.msra.mxu0 %v302_v22  ;;  %1488 = vmatpush3.msra.mxu1 %v307_v26  ;;  %v270_v48 = vld [vmem:[#allocation6] sm:$0xff]  ;;  %v271_v51 = vld [vmem:[#allocation6 + $0x8] sm:$0xff]  ;;  %v272_v52 = vld [vmem:[#allocation6 + $0x10] sm:$0xff] }
  0x81   : > { %358 = vmatprep.subr.mxu0 %v300_v24  ;;  %1489 = vmatprep.subr.mxu1 %v304_v29  ;;  %v273_v53 = vld [vmem:[#allocation6 + $0x18] sm:$0xff]  ;;  %v274_v54 = vld [vmem:[#allocation6 + $0x20] sm:$0xff]  ;;  %v275_v55 = vld [vmem:[#allocation6 + $0x28] sm:$0xff] }
  0x82   : > { %359 = vmatpush1.msra.mxu0 %v299_v25  ;;  %1490 = vmatpush3.msra.mxu1 %v304_v29  ;;  %v276_v56 = vld [vmem:[#allocation6 + $0x30] sm:$0xff]  ;;  %v277_v57 = vld [vmem:[#allocation6 + $0x38] sm:$0xff] }
  0x83   : > { %360 = vmatprep.subr.mxu0 %v297_v27  ;;  %1491 = vmatprep.subr.mxu1 %v301_v32 }
  0x84   : > { %361 = vmatpush1.msra.mxu0 %v296_v28  ;;  %1492 = vmatpush3.msra.mxu1 %v301_v32 }
  0x85   : > { %362 = vmatprep.subr.mxu0 %v294_v30  ;;  %1493 = vmatprep.subr.mxu1 %v298_v35 }
  0x86   : > { %363 = vmatpush1.msra.mxu0 %v293_v31  ;;  %1494 = vmatpush3.msra.mxu1 %v298_v35 }
  0x87   : > { %364 = vmatprep.subr.mxu0 %v291_v33  ;;  %1495 = vmatprep.subr.mxu1 %v295_v38 }
  0x88   : > { %365 = vmatpush1.msra.mxu0 %v290_v34  ;;  %1496 = vmatpush3.msra.mxu1 %v295_v38 }
  0x89   : > { %366 = vmatprep.subr.mxu0 %v288_v36  ;;  %1497 = vmatprep.subr.mxu1 %v292_v41 }
  0x8a   : > { %367 = vmatpush1.msra.mxu0 %v287_v37  ;;  %1498 = vmatpush3.msra.mxu1 %v292_v41 }
  0x8b   : > { %368 = vmatprep.subr.mxu0 %v285_v39  ;;  %1499 = vmatprep.subr.mxu1 %v289_v44 }
  0x8c   : > { %369 = vmatpush1.msra.mxu0 %v284_v40  ;;  %1500 = vmatpush3.msra.mxu1 %v289_v44 }
  0x8d   : > { %370 = vmatprep.subr.mxu0 %v282_v42  ;;  %1501 = vmatprep.subr.mxu1 %v286_v47 }
  0x8e   : > { %371 = vmatpush1.msra.mxu0 %v281_v43  ;;  %1502 = vmatpush3.msra.mxu1 %v286_v47 }
  0x8f   : > { %372 = vmatprep.subr.mxu0 %v279_v45  ;;  %1503 = vmatprep.subr.mxu1 %v283_v49 }
  0x90   : > { %373 = vmatpush1.msra.mxu0 %v278_v46  ;;  %1504 = vmatpush3.msra.mxu1 %v283_v49 }
  0x91   : > { %407 = vmatmul.mubr.f32.vlgmr.msra.gmra.mxu0 %v270_v48  ;;  %1507 = vmatprep.mubr.f32.mxu1 %v270_v48 }
  0x92   : > { %412 = vmatprep.mubr.f32.mxu0 %v1993_v5  ;;  %1505 = vmatprep.subr.mxu1 %v280_v50 }
  0x93   : > { %1506 = vmatpush3.msra.mxu1 %v280_v50 }
  0x94   : > { %1508 = vmatmul.mubr.f32.vlgmr.msra.gmra.mxu1 %v271_v51 }
  0x95   : > { %413 = vmatmul.mubr.f32.gmra.mxu0 %v271_v51  ;;  %1510 = vmatprep.mubr.f32.mxu1 %v272_v52 }
  0x96   : > { %418 = vmatprep.mubr.f32.mxu0 %v1993_v5 }
  0x98   : > { %1511 = vmatmul.mubr.f32.gmra.mxu1 %v273_v53 }
  0x99   : > { %419 = vmatmul.mubr.f32.gmra.mxu0 %v272_v52  ;;  %1513 = vmatprep.mubr.f32.mxu1 %v274_v54 }
  0x9a   : > { %424 = vmatprep.mubr.f32.mxu0 %v1993_v5 }
  0x9c   : > { %1514 = vmatmul.mubr.f32.gmra.mxu1 %v275_v55 }
  0x9d   : > { %425 = vmatmul.mubr.f32.gmra.mxu0 %v273_v53  ;;  %1516 = vmatprep.mubr.f32.mxu1 %v276_v56 }
  0x9e   : > { %430 = vmatprep.mubr.f32.mxu0 %v1993_v5 }
  0xa0   : > { %1517 = vmatmul.mubr.f32.gmra.mxu1 %v277_v57 }
  0xa1   : > { %431 = vmatmul.mubr.f32.gmra.mxu0 %v274_v54 }
  0xa2   : > { %436 = vmatprep.mubr.f32.mxu0 %v1993_v5 }
  0xa5   : > { %437 = vmatmul.mubr.f32.gmra.mxu0 %v275_v55 }
  0xa6   : > { %442 = vmatprep.mubr.f32.mxu0 %v1993_v5 }
  0xa9   : > { %443 = vmatmul.mubr.f32.gmra.mxu0 %v276_v56 }
  0xaa   : > { %448 = vmatprep.mubr.f32.mxu0 %v1993_v5 }
  0xad   : > { %449 = vmatmul.mubr.f32.gmra.mxu0 %v277_v57 }
 0x151   : > { %v408_v63 = vpop.f32.mrf.mxu0 }
 0x152   : > { %v409_v23 = vadd.f32 %v408_v63, %v2277_v12 }
 0x153   : > { %v410_v1 = vpop.f32.mrf.mxu0 }
 0x154   : > { %v411_v3 = vadd.f32 %v410_v1, %v2268_v62  ;;  %v1509_v8 = vpop.f32.mrf.mxu1 }
 0x155   : > { %v414_v6 = vpop.f32.mrf.mxu0  ;;  %v527_v9 = vadd.f32 %v1509_v8, %v2271_v2 }
 0x156   : > { %v1388_v7 = vmul.f32 -1.442695, %v411_v3  ;;  %v521_v11 = vpop.f32.mrf.mxu1  ;;  %v415_v34 = vadd.f32 %v414_v6, %v2277_v12 }
 0x157   : > { %v416_v5 = vpop.f32.mrf.mxu0  ;;  %v1397_v14 = vmul.f32 -1.442695, %v527_v9  ;;  %v522_v15 = vadd.f32 %v521_v11, %v2271_v2 }
 0x158   : > { %1646 = vpow2.f32 %v1388_v7  ;;  %v417_v10 = vadd.f32 %v416_v5, %v2268_v62  ;;  %v1512_v17 = vpop.f32.mrf.mxu1 }
 0x159   : > { %v420_v13 = vpop.f32.mrf.mxu0  ;;  %1648 = vpow2.f32 %v1397_v14  ;;  %v1396_v19 = vmul.f32 -1.442695, %v522_v15  ;;  %v537_v20 = vadd.f32 %v1512_v17, %v2271_v2 }
 0x15a   : > { %v1389_v16 = vmul.f32 -1.442695, %v417_v10  ;;  %v531_v22 = vpop.f32.mrf.mxu1  ;;  %v421_v48 = vadd.f32 %v420_v13, %v2277_v12 }
 0x15b   : > { %v422_v18 = vpop.f32.mrf.mxu0  ;;  %v1399_v25 = vmul.f32 -1.442695, %v537_v20  ;;  %v532_v26 = vadd.f32 %v531_v22, %v2271_v2 }
 0x15c   : > { %1650 = vpow2.f32 %v1389_v16  ;;  %v423_v21 = vadd.f32 %v422_v18, %v2268_v62  ;;  %v1515_v28 = vpop.f32.mrf.mxu1 }
 0x15d   : > { %v426_v24 = vpop.f32.mrf.mxu0  ;;  %1652 = vpow2.f32 %v1396_v19  ;;  %v1398_v30 = vmul.f32 -1.442695, %v532_v26  ;;  %v547_v31 = vadd.f32 %v1515_v28, %v2271_v2 }
 0x15e   : > { %v1390_v27 = vmul.f32 -1.442695, %v423_v21  ;;  %1654 = vpow2.f32 %v1399_v25  ;;  %v541_v33 = vpop.f32.mrf.mxu1  ;;  %v427_v1 = vadd.f32 %v426_v24, %v2277_v12 }
 0x15f   : > { %v428_v29 = vpop.f32.mrf.mxu0  ;;  %v1401_v36 = vmul.f32 -1.442695, %v547_v31  ;;  %v542_v37 = vadd.f32 %v541_v33, %v2271_v2 }
 0x160   : > { %1656 = vpow2.f32 %v1390_v27  ;;  %v429_v32 = vadd.f32 %v428_v29, %v2268_v62  ;;  %v1518_v39 = vpop.f32.mrf.mxu1 }
 0x161   : > { %1658 = vtanh.f32 %v409_v23  ;;  %v2287_v35 = vpop.f32.mrf.mxu0  ;;  %v1400_v41 = vmul.f32 -1.442695, %v542_v37  ;;  %v557_v42 = vadd.f32 %v1518_v39, %v2271_v2 }
 0x162   : > { %v1391_v38 = vmul.f32 -1.442695, %v429_v32  ;;  %1660 = vpow2.f32 %v1398_v30  ;;  %v551_v13 = vpop.f32.mrf.mxu1  ;;  %v433_v21 = vadd.f32 %v2287_v35, %v2277_v12 }
 0x163   : > { %v434_v40 = vpop.f32.mrf.mxu0  ;;  %1662 = vpow2.f32 %v1401_v36  ;;  %v1403_v46 = vmul.f32 -1.442695, %v557_v42  ;;  %v552_v22 = vadd.f32 %v551_v13, %v2271_v2 }
 0x164   : > { %1664 = vpow2.f32 %v1391_v38  ;;  %v435_v43 = vadd.f32 %v434_v40, %v2268_v62 }
 0x165   : > { %v1647_v44 = vpop.eup %1646  ;;  %1666 = vtanh.f32 %v415_v34  ;;  %v2292_v45 = vpop.f32.mrf.mxu0  ;;  %v1402_v32 = vmul.f32 -1.442695, %v552_v22 }
 0x166   : > { %v592_v47 = vadd.f32 1.0, %v1647_v44  ;;  %v1392_v49 = vmul.f32 -1.442695, %v435_v43  ;;  %1668 = vpow2.f32 %v1400_v41  ;;  %v1649_v51 = vpop.eup %1648  ;;  %v439_v2 = vadd.f32 %v2292_v45, %v2277_v12 }
 0x167   : > { %v440_v50 = vpop.f32.mrf.mxu0  ;;  %1670 = vpow2.f32 %v1403_v46  ;;  %v673_v54 = vadd.f32 1.0, %v1649_v51 }
 0x168   : > { %1672 = vrcp.f32 %v592_v47  ;;  %v441_v52 = vadd.f32 %v440_v50, %v2268_v62 }
 0x169   : > { %v1651_v53 = vpop.eup %1650  ;;  %1674 = vpow2.f32 %v1392_v49  ;;  %v2296_v55 = vpop.f32.mrf.mxu0 }
 0x16a   : > { %v593_v56 = vadd.f32 1.0, %v1651_v53  ;;  %1676 = vtanh.f32 %v421_v48  ;;  %v1393_v57 = vmul.f32 -1.442695, %v441_v52  ;;  %v1653_v58 = vpop.eup %1652  ;;  %v445_v47 = vadd.f32 %v2296_v55, %v2277_v12 }
 0x16b   : > { %1678 = vrcp.f32 %v673_v54  ;;  %v446_v59 = vpop.f32.mrf.mxu0  ;;  %v1655_v60 = vpop.eup %1654  ;;  %v672_v61 = vadd.f32 1.0, %v1653_v58 }
 0x16c   : > { %1680 = vrcp.f32 %v593_v56  ;;  %v675_v3 = vadd.f32 1.0, %v1655_v60  ;;  %v447_v4 = vadd.f32 %v446_v59, %v2268_v62 }
 0x16d   : > { %v1657_v63 = vpop.eup %1656  ;;  %1682 = vpow2.f32 %v1393_v57  ;;  %v2300_v6 = vpop.f32.mrf.mxu0 }
 0x16e   : > { %v1659_v7 = vpop.eup %1658  ;;  %v594_v8 = vadd.f32 1.0, %v1657_v63  ;;  %1684 = vrcp.f32 %v672_v61  ;;  %v1394_v16 = vmul.f32 -1.442695, %v447_v4  ;;  %v451_v57 = vadd.f32 %v2300_v6, %v2277_v12 }
 0x16f   : > { %v1661_v5 = vpop.eup %1660  ;;  %1686 = vrcp.f32 %v675_v3  ;;  %v452_v9 = vpop.f32.mrf.mxu0 }
 0x170   : > { %v1663_v10 = vpop.eup %1662  ;;  %1688 = vrcp.f32 %v594_v8  ;;  %v674_v11 = vadd.f32 1.0, %v1661_v5  ;;  %v453_v19 = vadd.f32 %v452_v9, %v2268_v62 }
 0x171   : > { %v1665_v14 = vpop.eup %1664  ;;  %1690 = vtanh.f32 %v427_v1  ;;  %v677_v15 = vadd.f32 1.0, %v1663_v10 }
 0x172   : > { %v1667_v17 = vpop.eup %1666  ;;  %v595_v18 = vadd.f32 1.0, %v1665_v14  ;;  %1692 = vrcp.f32 %v674_v11  ;;  %v1395_v30 = vmul.f32 -1.442695, %v453_v19 }
 0x173   : > { %v1669_v20 = vpop.eup %1668  ;;  %1694 = vrcp.f32 %v677_v15 }
 0x174   : > { %v1671_v23 = vpop.eup %1670  ;;  %1696 = vrcp.f32 %v595_v18  ;;  %v676_v24 = vadd.f32 1.0, %v1669_v20 }
 0x175   : > { %v1673_v25 = vpop.eup %1672  ;;  %1698 = vpow2.f32 %v1394_v16  ;;  %v679_v26 = vadd.f32 1.0, %v1671_v23 }
 0x176   : > { %v1675_v27 = vpop.eup %1674  ;;  %v616_v28 = vmul.f32 %v1673_v25, %v1659_v7  ;;  %v632_v29 = vsub.f32 1.0, %v1673_v25  ;;  %1700 = vrcp.f32 %v676_v24 }
 0x177   : > { %v1677_v31 = vpop.eup %1676  ;;  %1702 = vtanh.f32 %v433_v21  ;;  %v596_v62 = vadd.f32 1.0, %v1675_v27 }
 0x178   : > { %v1679_v33 = vpop.eup %1678  ;;  %624 = vst [vmem:[#allocation2 + $0x30] sm:$0xff] %v616_v28  ;;  %640 = vst [vmem:[#allocation3] sm:$0xff] %v632_v29  ;;  %1704 = vrcp.f32 %v679_v26 }
 0x179   : > { %v1681_v34 = vpop.eup %1680  ;;  %697 = vst [vmem:[#allocation4 + $0x20] sm:$0xff] %v1679_v33  ;;  %1706 = vrcp.f32 %v596_v62 }
 0x17a   : > { %v1683_v35 = vpop.eup %1682  ;;  %v617_v36 = vmul.f32 %v1681_v34, %v1667_v17  ;;  %v633_v37 = vsub.f32 1.0, %v1681_v34  ;;  %1708 = vpow2.f32 %v1395_v30 }
 0x17b   : > { %v1685_v38 = vpop.eup %1684  ;;  %v597_v39 = vadd.f32 1.0, %v1683_v35  ;;  %1710 = vpow2.f32 %v1402_v32 }
 0x17c   : > { %v1687_v40 = vpop.eup %1686  ;;  %625 = vst [vmem:[#allocation2] sm:$0xff] %v617_v36  ;;  %641 = vst [vmem:[#allocation3 + $0x18] sm:$0xff] %v633_v37  ;;  %1712 = vtanh.f32 %v439_v2 }
 0x17d   : > { %696 = vst [vmem:[#allocation4 + $0x28] sm:$0xff] %v1685_v38  ;;  %v1689_v41 = vpop.eup %1688  ;;  %699 = vst [vmem:[#allocation4 + $0x10] sm:$0xff] %v1687_v40  ;;  %1714 = vrcp.f32 %v597_v39 }
 0x17e   : > { %v1691_v42 = vpop.eup %1690  ;;  %v618_v43 = vmul.f32 %v1689_v41, %v1677_v31  ;;  %v634_v44 = vsub.f32 1.0, %v1689_v41  ;;  %1716 = vtanh.f32 %v445_v47 }
 0x17f   : > { %v1693_v45 = vpop.eup %1692 }
 0x180   : > { %v1695_v46 = vpop.eup %1694  ;;  %626 = vst [vmem:[#allocation2 + $0x18] sm:$0xff] %v618_v43  ;;  %642 = vst [vmem:[#allocation3 + $0x10] sm:$0xff] %v634_v44 }
 0x181   : > { %698 = vst [vmem:[#allocation4 + $0x38] sm:$0xff] %v1693_v45  ;;  %v1697_v48 = vpop.eup %1696  ;;  %701 = vst [vmem:[#allocation4 + $0x30] sm:$0xff] %v1695_v46 }
 0x182   : > { %v1699_v49 = vpop.eup %1698  ;;  %v619_v50 = vmul.f32 %v1697_v48, %v1691_v42  ;;  %v635_v51 = vsub.f32 1.0, %v1697_v48 }
 0x183   : > { %v1701_v52 = vpop.eup %1700  ;;  %v598_v53 = vadd.f32 1.0, %v1699_v49 }
 0x184   : > { %v1703_v54 = vpop.eup %1702  ;;  %627 = vst [vmem:[#allocation2 + $0x10] sm:$0xff] %v619_v50  ;;  %643 = vst [vmem:[#allocation3 + $0x20] sm:$0xff] %v635_v51 }
 0x185   : > { %700 = vst [vmem:[#allocation4 + $0x8] sm:$0xff] %v1701_v52  ;;  %v1705_v56 = vpop.eup %1704  ;;  %1718 = vrcp.f32 %v598_v53 }
 0x186   : > { %v1707_v58 = vpop.eup %1706  ;;  %703 = vst [vmem:[#allocation4] sm:$0xff] %v1705_v56  ;;  %1720 = vtanh.f32 %v451_v57 }
 0x187   : > { %v1709_v55 = vpop.eup %1708  ;;  %v620_v59 = vmul.f32 %v1707_v58, %v1703_v54  ;;  %v636_v60 = vsub.f32 1.0, %v1707_v58 }
 0x188   : > { %v1711_v61 = vpop.eup %1710  ;;  %v599_v63 = vadd.f32 1.0, %v1709_v55 }
 0x189   : > { %v1713_v1 = vpop.eup %1712  ;;  %628 = vst [vmem:[#allocation2 + $0x8] sm:$0xff] %v620_v59  ;;  %644 = vst [vmem:[#allocation3 + $0x28] sm:$0xff] %v636_v60  ;;  %v678_v3 = vadd.f32 1.0, %v1711_v61 }
 0x18a   : > { %v1715_v4 = vpop.eup %1714  ;;  %1722 = vrcp.f32 %v599_v63 }
 0x18b   : > { %v621_v7 = vmul.f32 %v1715_v4, %v1713_v1  ;;  %v637_v8 = vsub.f32 1.0, %v1715_v4  ;;  %1724 = vrcp.f32 %v678_v3  ;;  %v1717_v12 = vpop.eup %1716 }
 0x18d   : > { %629 = vst [vmem:[#allocation2 + $0x20] sm:$0xff] %v621_v7  ;;  %645 = vst [vmem:[#allocation3 + $0x8] sm:$0xff] %v637_v8 }
 0x192   : > { %v1719_v6 = vpop.eup %1718 }
 0x193   : > { %v622_v5 = vmul.f32 %v1719_v6, %v1717_v12  ;;  %v638_v9 = vsub.f32 1.0, %v1719_v6  ;;  %v1721_v10 = vpop.eup %1720 }
 0x195   : > { %630 = vst [vmem:[#allocation2 + $0x28] sm:$0xff] %v622_v5  ;;  %646 = vst [vmem:[#allocation3 + $0x30] sm:$0xff] %v638_v9 }
 0x197   : > { %v1723_v11 = vpop.eup %1722 }
 0x198   : > { %v1725_v13 = vpop.eup %1724  ;;  %v623_v14 = vmul.f32 %v1723_v11, %v1721_v10  ;;  %v639_v15 = vsub.f32 1.0, %v1723_v11 }
 0x199   : > { %702 = vst [vmem:[#allocation4 + $0x18] sm:$0xff] %v1725_v13 }
 0x19a   : > { %631 = vst [vmem:[#allocation2 + $0x38] sm:$0xff] %v623_v14  ;;  %647 = vst [vmem:[#allocation3 + $0x38] sm:$0xff] %v639_v15 }
 0x19b PF: > { %p1404_p4 = scmp.le.s32.totalorder %s2105_s28, 0 }
 0x19d   : > { %707 = sbr.rel (%p1404_p4) target bundleno = 717 (0x2cd), region = 52 }
 0x1a2   : > { %v762_v16 = vld [vmem:[%s2197_s12 + $0x170] sm:$0xff]  ;;  %v761_v17 = vld [vmem:[%s2197_s12 + $0x168] sm:$0xff]  ;;  %v759_v18 = vld [vmem:[%s2197_s12 + $0x158] sm:$0xff]  ;;  %v1994_v20 = vmov 0.0   ;;  %v765_v9 = vlaneseq }
 0x1a3   : > { %780 = vmatprep.subr.mxu0 %v762_v16  ;;  %v758_v19 = vld [vmem:[%s2197_s12 + $0x150] sm:$0xff]  ;;  %844 = vmatprep.mubr.f32.mxu0 %v1994_v20  ;;  %v756_v21 = vld [vmem:[%s2197_s12 + $0x140] sm:$0xff]  ;;  %v755_v22 = vld [vmem:[%s2197_s12 + $0x138] sm:$0xff] }
 0x1a4   : > { %781 = vmatpush1.msra.mxu0 %v761_v17  ;;  %v753_v23 = vld [vmem:[%s2197_s12 + $0x128] sm:$0xff]  ;;  %v752_v24 = vld [vmem:[%s2197_s12 + $0x120] sm:$0xff]  ;;  %v763_v25 = vld [vmem:[%s2197_s12 + $0x178] sm:$0xff]  ;;  %v766_v10 = vshrl.u32 %v765_v9, 7 }
 0x1a5   : > { %782 = vmatprep.subr.mxu0 %v759_v18  ;;  %v750_v26 = vld [vmem:[%s2197_s12 + $0x110] sm:$0xff]  ;;  %1519 = vmatprep.subr.mxu1 %v763_v25  ;;  %v760_v27 = vld [vmem:[%s2197_s12 + $0x160] sm:$0xff]  ;;  %v749_v28 = vld [vmem:[%s2197_s12 + $0x108] sm:$0xff] }
 0x1a6   : > { %783 = vmatpush1.msra.mxu0 %v758_v19  ;;  %1520 = vmatpush3.msra.mxu1 %v763_v25  ;;  %v757_v29 = vld [vmem:[%s2197_s12 + $0x148] sm:$0xff]  ;;  %v747_v30 = vld [vmem:[%s2197_s12 + $0xf8] sm:$0xff]  ;;  %v746_v31 = vld [vmem:[%s2197_s12 + $0xf0] sm:$0xff]  ;;  %v771_v11 = vsub.s32 1, %v766_v10  ;;  %v775_v13 = vsub.s32 2, %v766_v10  ;;  %v767_v19 = vsub.s32 0, %v766_v10 }
 0x1a7   : > { %784 = vmatprep.subr.mxu0 %v756_v21  ;;  %1521 = vmatprep.subr.mxu1 %v760_v27  ;;  %v754_v62 = vld [vmem:[%s2197_s12 + $0x130] sm:$0xff]  ;;  %v744_v32 = vld [vmem:[%s2197_s12 + $0xe0] sm:$0xff]  ;;  %v743_v33 = vld [vmem:[%s2197_s12 + $0xd8] sm:$0xff] }
 0x1a8   : > { %785 = vmatpush1.msra.mxu0 %v755_v22  ;;  %1522 = vmatpush3.msra.mxu1 %v760_v27  ;;  %v751_v2 = vld [vmem:[%s2197_s12 + $0x118] sm:$0xff]  ;;  %v741_v34 = vld [vmem:[%s2197_s12 + $0xc8] sm:$0xff]  ;;  %v740_v35 = vld [vmem:[%s2197_s12 + $0xc0] sm:$0xff]  ;;  %v2370_v14 = vrot.slane %v2205_v0, %v771_v11  ;;  %v2373_v17 = vrot.slane %v2205_v0, %v775_v13  ;;  %v2379_v27 = vrot.slane %v2205_v0, %v767_v19 }
 0x1a9   : > { %786 = vmatprep.subr.mxu0 %v753_v23  ;;  %1523 = vmatprep.subr.mxu1 %v757_v29  ;;  %v748_v36 = vld [vmem:[%s2197_s12 + $0x100] sm:$0xff]  ;;  %v738_v37 = vld [vmem:[%s2197_s12 + $0xb0] sm:$0xff]  ;;  %v737_v38 = vld [vmem:[%s2197_s12 + $0xa8] sm:$0xff] }
 0x1aa   : > { %787 = vmatpush1.msra.mxu0 %v752_v24  ;;  %1524 = vmatpush3.msra.mxu1 %v757_v29  ;;  %v745_v39 = vld [vmem:[%s2197_s12 + $0xe8] sm:$0xff]  ;;  %v735_v40 = vld [vmem:[%s2197_s12 + $0x98] sm:$0xff]  ;;  %v734_v41 = vld [vmem:[%s2197_s12 + $0x90] sm:$0xff] }
 0x1ab   : > { %788 = vmatprep.subr.mxu0 %v750_v26  ;;  %1525 = vmatprep.subr.mxu1 %v754_v62  ;;  %v742_v42 = vld [vmem:[%s2197_s12 + $0xd0] sm:$0xff]  ;;  %v732_v43 = vld [vmem:[%s2197_s12 + $0x80] sm:$0xff]  ;;  %v731_v44 = vld [vmem:[%s2197_s12 + $0x78] sm:$0xff] }
 0x1ac   : > { %789 = vmatpush1.msra.mxu0 %v749_v28  ;;  %1526 = vmatpush3.msra.mxu1 %v754_v62  ;;  %v739_v45 = vld [vmem:[%s2197_s12 + $0xb8] sm:$0xff]  ;;  %v729_v46 = vld [vmem:[%s2197_s12 + $0x68] sm:$0xff]  ;;  %v728_v47 = vld [vmem:[%s2197_s12 + $0x60] sm:$0xff] }
 0x1ad   : > { %790 = vmatprep.subr.mxu0 %v747_v30  ;;  %1527 = vmatprep.subr.mxu1 %v751_v2  ;;  %v736_v48 = vld [vmem:[%s2197_s12 + $0xa0] sm:$0xff]  ;;  %v726_v49 = vld [vmem:[%s2197_s12 + $0x50] sm:$0xff]  ;;  %v725_v50 = vld [vmem:[%s2197_s12 + $0x48] sm:$0xff] }
 0x1ae   : > { %791 = vmatpush1.msra.mxu0 %v746_v31  ;;  %1528 = vmatpush3.msra.mxu1 %v751_v2  ;;  %v733_v51 = vld [vmem:[%s2197_s12 + $0x88] sm:$0xff]  ;;  %v723_v52 = vld [vmem:[%s2197_s12 + $0x38] sm:$0xff]  ;;  %v722_v53 = vld [vmem:[%s2197_s12 + $0x30] sm:$0xff] }
 0x1af   : > { %792 = vmatprep.subr.mxu0 %v744_v32  ;;  %1529 = vmatprep.subr.mxu1 %v748_v36  ;;  %v730_v54 = vld [vmem:[%s2197_s12 + $0x70] sm:$0xff]  ;;  %v720_v56 = vld [vmem:[%s2197_s12 + $0x20] sm:$0xff]  ;;  %v719_v57 = vld [vmem:[%s2197_s12 + $0x18] sm:$0xff] }
 0x1b0   : > { %793 = vmatpush1.msra.mxu0 %v743_v33  ;;  %1530 = vmatpush3.msra.mxu1 %v748_v36  ;;  %v727_v58 = vld [vmem:[%s2197_s12 + $0x58] sm:$0xff]  ;;  %v717_v55 = vld [vmem:[%s2197_s12 + $0x8] sm:$0xff]  ;;  %v716_v59 = vld [vmem:[%s2197_s12] sm:$0xff] }
 0x1b1   : > { %794 = vmatprep.subr.mxu0 %v741_v34  ;;  %1531 = vmatprep.subr.mxu1 %v745_v39  ;;  %v724_v60 = vld [vmem:[%s2197_s12 + $0x40] sm:$0xff]  ;;  %v721_v63 = vld [vmem:[%s2197_s12 + $0x28] sm:$0xff]  ;;  %v718_v1 = vld [vmem:[%s2197_s12 + $0x10] sm:$0xff] }
 0x1b2   : > { %795 = vmatpush1.msra.mxu0 %v740_v35  ;;  %1532 = vmatpush3.msra.mxu1 %v745_v39  ;;  %v708_v61 = vld [vmem:[#allocation12] sm:$0xff]  ;;  %v709_v3 = vld [vmem:[#allocation12 + $0x8] sm:$0xff]  ;;  %v710_v4 = vld [vmem:[#allocation12 + $0x10] sm:$0xff] }
 0x1b3   : > { %796 = vmatprep.subr.mxu0 %v738_v37  ;;  %1533 = vmatprep.subr.mxu1 %v742_v42  ;;  %v711_v7 = vld [vmem:[#allocation12 + $0x18] sm:$0xff]  ;;  %v712_v8 = vld [vmem:[#allocation12 + $0x20] sm:$0xff]  ;;  %v713_v12 = vld [vmem:[#allocation12 + $0x28] sm:$0xff] }
 0x1b4   : > { %797 = vmatpush1.msra.mxu0 %v737_v38  ;;  %1534 = vmatpush3.msra.mxu1 %v742_v42  ;;  %v714_v6 = vld [vmem:[#allocation12 + $0x30] sm:$0xff]  ;;  %v715_v5 = vld [vmem:[#allocation12 + $0x38] sm:$0xff] }
 0x1b5   : > { %798 = vmatprep.subr.mxu0 %v735_v40  ;;  %1535 = vmatprep.subr.mxu1 %v739_v45 }
 0x1b6   : > { %799 = vmatpush1.msra.mxu0 %v734_v41  ;;  %1536 = vmatpush3.msra.mxu1 %v739_v45 }
 0x1b7   : > { %800 = vmatprep.subr.mxu0 %v732_v43  ;;  %1537 = vmatprep.subr.mxu1 %v736_v48 }
 0x1b8   : > { %801 = vmatpush1.msra.mxu0 %v731_v44  ;;  %1538 = vmatpush3.msra.mxu1 %v736_v48 }
 0x1b9   : > { %802 = vmatprep.subr.mxu0 %v729_v46  ;;  %1539 = vmatprep.subr.mxu1 %v733_v51 }
 0x1ba   : > { %803 = vmatpush1.msra.mxu0 %v728_v47  ;;  %1540 = vmatpush3.msra.mxu1 %v733_v51 }
 0x1bb   : > { %804 = vmatprep.subr.mxu0 %v726_v49  ;;  %1541 = vmatprep.subr.mxu1 %v730_v54 }
 0x1bc   : > { %805 = vmatpush1.msra.mxu0 %v725_v50  ;;  %1542 = vmatpush3.msra.mxu1 %v730_v54 }
 0x1bd   : > { %806 = vmatprep.subr.mxu0 %v723_v52  ;;  %1543 = vmatprep.subr.mxu1 %v727_v58 }
 0x1be   : > { %807 = vmatpush1.msra.mxu0 %v722_v53  ;;  %1544 = vmatpush3.msra.mxu1 %v727_v58 }
 0x1bf   : > { %808 = vmatprep.subr.mxu0 %v720_v56  ;;  %1545 = vmatprep.subr.mxu1 %v724_v60 }
 0x1c0   : > { %809 = vmatpush1.msra.mxu0 %v719_v57  ;;  %1546 = vmatpush3.msra.mxu1 %v724_v60 }
 0x1c1   : > { %810 = vmatprep.subr.mxu0 %v717_v55  ;;  %1547 = vmatprep.subr.mxu1 %v721_v63 }
 0x1c2   : > { %811 = vmatpush1.msra.mxu0 %v716_v59  ;;  %1548 = vmatpush3.msra.mxu1 %v721_v63 }
 0x1c3   : > { %845 = vmatmul.mubr.f32.vlgmr.msra.gmra.mxu0 %v708_v61  ;;  %1551 = vmatprep.mubr.f32.mxu1 %v708_v61 }
 0x1c4   : > { %850 = vmatprep.mubr.f32.mxu0 %v1994_v20  ;;  %1549 = vmatprep.subr.mxu1 %v718_v1 }
 0x1c5   : > { %1550 = vmatpush3.msra.mxu1 %v718_v1 }
 0x1c6   : > { %1552 = vmatmul.mubr.f32.vlgmr.msra.gmra.mxu1 %v709_v3 }
 0x1c7   : > { %851 = vmatmul.mubr.f32.gmra.mxu0 %v709_v3  ;;  %1554 = vmatprep.mubr.f32.mxu1 %v710_v4 }
 0x1c8   : > { %856 = vmatprep.mubr.f32.mxu0 %v1994_v20 }
 0x1ca   : > { %1555 = vmatmul.mubr.f32.gmra.mxu1 %v711_v7 }
 0x1cb   : > { %857 = vmatmul.mubr.f32.gmra.mxu0 %v710_v4  ;;  %1557 = vmatprep.mubr.f32.mxu1 %v712_v8 }
 0x1cc   : > { %862 = vmatprep.mubr.f32.mxu0 %v1994_v20 }
 0x1ce   : > { %1558 = vmatmul.mubr.f32.gmra.mxu1 %v713_v12 }
 0x1cf   : > { %863 = vmatmul.mubr.f32.gmra.mxu0 %v711_v7  ;;  %1560 = vmatprep.mubr.f32.mxu1 %v714_v6 }
 0x1d0   : > { %868 = vmatprep.mubr.f32.mxu0 %v1994_v20 }
 0x1d2   : > { %1561 = vmatmul.mubr.f32.gmra.mxu1 %v715_v5 }
 0x1d3   : > { %869 = vmatmul.mubr.f32.gmra.mxu0 %v712_v8 }
 0x1d4   : > { %874 = vmatprep.mubr.f32.mxu0 %v1994_v20 }
 0x1d7   : > { %875 = vmatmul.mubr.f32.gmra.mxu0 %v713_v12 }
 0x1d8   : > { %880 = vmatprep.mubr.f32.mxu0 %v1994_v20 }
 0x1db   : > { %881 = vmatmul.mubr.f32.gmra.mxu0 %v714_v6 }
 0x1dc   : > { %886 = vmatprep.mubr.f32.mxu0 %v1994_v20 }
 0x1df   : > { %887 = vmatmul.mubr.f32.gmra.mxu0 %v715_v5 }
 0x283   : > { %v846_v15 = vpop.f32.mrf.mxu0 }
 0x284   : > { %v847_v36 = vadd.f32 %v846_v15, %v2379_v27 }
 0x285   : > { %v848_v16 = vpop.f32.mrf.mxu0 }
 0x286   : > { %v849_v18 = vadd.f32 %v848_v16, %v2370_v14  ;;  %v1553_v23 = vpop.f32.mrf.mxu1 }
 0x287   : > { %v852_v21 = vpop.f32.mrf.mxu0  ;;  %v965_v24 = vadd.f32 %v1553_v23, %v2373_v17 }
 0x288   : > { %v1405_v22 = vmul.f32 -1.442695, %v849_v18  ;;  %v959_v26 = vpop.f32.mrf.mxu1  ;;  %v853_v46 = vadd.f32 %v852_v21, %v2379_v27 }
 0x289   : > { %v854_v20 = vpop.f32.mrf.mxu0  ;;  %v1414_v29 = vmul.f32 -1.442695, %v965_v24  ;;  %v960_v30 = vadd.f32 %v959_v26, %v2373_v17 }
 0x28a   : > { %1726 = vpow2.f32 %v1405_v22  ;;  %v855_v25 = vadd.f32 %v854_v20, %v2370_v14  ;;  %v1556_v62 = vpop.f32.mrf.mxu1 }
 0x28b   : > { %v858_v28 = vpop.f32.mrf.mxu0  ;;  %1728 = vpow2.f32 %v1414_v29  ;;  %v1413_v33 = vmul.f32 -1.442695, %v960_v30  ;;  %v975_v2 = vadd.f32 %v1556_v62, %v2373_v17 }
 0x28c   : > { %v1406_v31 = vmul.f32 -1.442695, %v855_v25  ;;  %v969_v35 = vpop.f32.mrf.mxu1  ;;  %v859_v60 = vadd.f32 %v858_v28, %v2379_v27 }
 0x28d   : > { %v860_v32 = vpop.f32.mrf.mxu0  ;;  %v1416_v0 = vmul.f32 -1.442695, %v975_v2  ;;  %v970_v38 = vadd.f32 %v969_v35, %v2373_v17 }
 0x28e   : > { %1730 = vpow2.f32 %v1406_v31  ;;  %v861_v34 = vadd.f32 %v860_v32, %v2370_v14  ;;  %v1559_v40 = vpop.f32.mrf.mxu1 }
 0x28f   : > { %v864_v37 = vpop.f32.mrf.mxu0  ;;  %1732 = vpow2.f32 %v1413_v33  ;;  %v1415_v42 = vmul.f32 -1.442695, %v970_v38  ;;  %v985_v43 = vadd.f32 %v1559_v40, %v2373_v17 }
 0x290   : > { %v1407_v39 = vmul.f32 -1.442695, %v861_v34  ;;  %1734 = vpow2.f32 %v1416_v0  ;;  %v979_v45 = vpop.f32.mrf.mxu1  ;;  %v865_v15 = vadd.f32 %v864_v37, %v2379_v27 }
 0x291   : > { %v866_v41 = vpop.f32.mrf.mxu0  ;;  %v1418_v48 = vmul.f32 -1.442695, %v985_v43  ;;  %v980_v49 = vadd.f32 %v979_v45, %v2373_v17 }
 0x292   : > { %1736 = vpow2.f32 %v1407_v39  ;;  %v867_v44 = vadd.f32 %v866_v41, %v2370_v14  ;;  %v1562_v51 = vpop.f32.mrf.mxu1 }
 0x293   : > { %1738 = vtanh.f32 %v847_v36  ;;  %v2389_v47 = vpop.f32.mrf.mxu0  ;;  %v1417_v53 = vmul.f32 -1.442695, %v980_v49  ;;  %v995_v54 = vadd.f32 %v1562_v51, %v2373_v17 }
 0x294   : > { %v1408_v50 = vmul.f32 -1.442695, %v867_v44  ;;  %1740 = vpow2.f32 %v1415_v42  ;;  %v989_v26 = vpop.f32.mrf.mxu1  ;;  %v871_v2 = vadd.f32 %v2389_v47, %v2379_v27 }
 0x295   : > { %v872_v52 = vpop.f32.mrf.mxu0  ;;  %1742 = vpow2.f32 %v1418_v48  ;;  %v1420_v55 = vmul.f32 -1.442695, %v995_v54  ;;  %v990_v34 = vadd.f32 %v989_v26, %v2373_v17 }
 0x296   : > { %1744 = vpow2.f32 %v1408_v50  ;;  %v873_v56 = vadd.f32 %v872_v52, %v2370_v14 }
 0x297   : > { %v1727_v57 = vpop.eup %1726  ;;  %1746 = vtanh.f32 %v853_v46  ;;  %v2394_v58 = vpop.f32.mrf.mxu0  ;;  %v1419_v43 = vmul.f32 -1.442695, %v990_v34 }
 0x298   : > { %v1030_v59 = vadd.f32 1.0, %v1727_v57  ;;  %v1409_v61 = vmul.f32 -1.442695, %v873_v56  ;;  %1748 = vpow2.f32 %v1417_v53  ;;  %v1729_v1 = vpop.eup %1728  ;;  %v877_v17 = vadd.f32 %v2394_v58, %v2379_v27 }
 0x299   : > { %v878_v63 = vpop.f32.mrf.mxu0  ;;  %1750 = vpow2.f32 %v1420_v55  ;;  %v1111_v7 = vadd.f32 1.0, %v1729_v1 }
 0x29a   : > { %1752 = vrcp.f32 %v1030_v59  ;;  %v879_v3 = vadd.f32 %v878_v63, %v2370_v14 }
 0x29b   : > { %v1731_v4 = vpop.eup %1730  ;;  %1754 = vpow2.f32 %v1409_v61  ;;  %v2398_v8 = vpop.f32.mrf.mxu0 }
 0x29c   : > { %v1031_v12 = vadd.f32 1.0, %v1731_v4  ;;  %1756 = vtanh.f32 %v859_v60  ;;  %v1410_v6 = vmul.f32 -1.442695, %v879_v3  ;;  %v1733_v5 = vpop.eup %1732  ;;  %v883_v55 = vadd.f32 %v2398_v8, %v2379_v27 }
 0x29d   : > { %1758 = vrcp.f32 %v1111_v7  ;;  %v884_v9 = vpop.f32.mrf.mxu0  ;;  %v1735_v10 = vpop.eup %1734  ;;  %v1110_v11 = vadd.f32 1.0, %v1733_v5 }
 0x29e   : > { %1760 = vrcp.f32 %v1031_v12  ;;  %v1113_v16 = vadd.f32 1.0, %v1735_v10  ;;  %v885_v18 = vadd.f32 %v884_v9, %v2370_v14 }
 0x29f   : > { %v1737_v13 = vpop.eup %1736  ;;  %1762 = vpow2.f32 %v1410_v6  ;;  %v2402_v19 = vpop.f32.mrf.mxu0 }
 0x2a0   : > { %v1739_v21 = vpop.eup %1738  ;;  %v1032_v22 = vadd.f32 1.0, %v1737_v13  ;;  %1764 = vrcp.f32 %v1110_v11  ;;  %v1411_v30 = vmul.f32 -1.442695, %v885_v18  ;;  %v889_v12 = vadd.f32 %v2402_v19, %v2379_v27 }
 0x2a1   : > { %v1741_v23 = vpop.eup %1740  ;;  %1766 = vrcp.f32 %v1113_v16  ;;  %v890_v20 = vpop.f32.mrf.mxu0 }
 0x2a2   : > { %v1743_v24 = vpop.eup %1742  ;;  %1768 = vrcp.f32 %v1032_v22  ;;  %v1112_v25 = vadd.f32 1.0, %v1741_v23  ;;  %v891_v32 = vadd.f32 %v890_v20, %v2370_v14 }
 0x2a3   : > { %v1745_v28 = vpop.eup %1744  ;;  %1770 = vtanh.f32 %v865_v15  ;;  %v1115_v29 = vadd.f32 1.0, %v1743_v24 }
 0x2a4   : > { %v1747_v31 = vpop.eup %1746  ;;  %v1033_v62 = vadd.f32 1.0, %v1745_v28  ;;  %1772 = vrcp.f32 %v1112_v25  ;;  %v1412_v41 = vmul.f32 -1.442695, %v891_v32 }
 0x2a5   : > { %v1749_v33 = vpop.eup %1748  ;;  %1774 = vrcp.f32 %v1115_v29 }
 0x2a6   : > { %v1751_v35 = vpop.eup %1750  ;;  %1776 = vrcp.f32 %v1033_v62  ;;  %v1114_v36 = vadd.f32 1.0, %v1749_v33 }
 0x2a7   : > { %v1753_v37 = vpop.eup %1752  ;;  %1778 = vpow2.f32 %v1411_v30  ;;  %v1117_v0 = vadd.f32 1.0, %v1751_v35 }
 0x2a8   : > { %v1755_v38 = vpop.eup %1754  ;;  %v1054_v39 = vmul.f32 %v1753_v37, %v1739_v21  ;;  %v1070_v40 = vsub.f32 1.0, %v1753_v37  ;;  %1780 = vrcp.f32 %v1114_v36 }
 0x2a9   : > { %v1757_v42 = vpop.eup %1756  ;;  %1782 = vtanh.f32 %v871_v2  ;;  %v1034_v14 = vadd.f32 1.0, %v1755_v38 }
 0x2aa   : > { %v1759_v44 = vpop.eup %1758  ;;  %1062 = vst [vmem:[#allocation2 + $0x30] sm:$0xff] %v1054_v39  ;;  %1078 = vst [vmem:[#allocation3] sm:$0xff] %v1070_v40  ;;  %1784 = vrcp.f32 %v1117_v0 }
 0x2ab   : > { %v1761_v45 = vpop.eup %1760  ;;  %1135 = vst [vmem:[#allocation4 + $0x20] sm:$0xff] %v1759_v44  ;;  %1786 = vrcp.f32 %v1034_v14 }
 0x2ac   : > { %v1763_v46 = vpop.eup %1762  ;;  %v1055_v47 = vmul.f32 %v1761_v45, %v1747_v31  ;;  %v1071_v48 = vsub.f32 1.0, %v1761_v45  ;;  %1788 = vpow2.f32 %v1412_v41 }
 0x2ad   : > { %v1765_v49 = vpop.eup %1764  ;;  %v1035_v50 = vadd.f32 1.0, %v1763_v46  ;;  %1790 = vpow2.f32 %v1419_v43 }
 0x2ae   : > { %v1767_v51 = vpop.eup %1766  ;;  %1063 = vst [vmem:[#allocation2] sm:$0xff] %v1055_v47  ;;  %1079 = vst [vmem:[#allocation3 + $0x18] sm:$0xff] %v1071_v48  ;;  %1792 = vtanh.f32 %v877_v17 }
 0x2af   : > { %1134 = vst [vmem:[#allocation4 + $0x28] sm:$0xff] %v1765_v49  ;;  %v1769_v52 = vpop.eup %1768  ;;  %1137 = vst [vmem:[#allocation4 + $0x10] sm:$0xff] %v1767_v51  ;;  %1794 = vrcp.f32 %v1035_v50 }
 0x2b0   : > { %v1771_v53 = vpop.eup %1770  ;;  %v1056_v54 = vmul.f32 %v1769_v52, %v1757_v42  ;;  %v1072_v56 = vsub.f32 1.0, %v1769_v52  ;;  %1796 = vtanh.f32 %v883_v55 }
 0x2b1   : > { %v1773_v57 = vpop.eup %1772 }
 0x2b2   : > { %v1775_v58 = vpop.eup %1774  ;;  %1064 = vst [vmem:[#allocation2 + $0x18] sm:$0xff] %v1056_v54  ;;  %1080 = vst [vmem:[#allocation3 + $0x10] sm:$0xff] %v1072_v56 }
 0x2b3   : > { %1136 = vst [vmem:[#allocation4 + $0x38] sm:$0xff] %v1773_v57  ;;  %v1777_v59 = vpop.eup %1776  ;;  %1139 = vst [vmem:[#allocation4 + $0x30] sm:$0xff] %v1775_v58 }
 0x2b4   : > { %v1779_v60 = vpop.eup %1778  ;;  %v1057_v61 = vmul.f32 %v1777_v59, %v1771_v53  ;;  %v1073_v63 = vsub.f32 1.0, %v1777_v59 }
 0x2b5   : > { %v1781_v1 = vpop.eup %1780  ;;  %v1036_v3 = vadd.f32 1.0, %v1779_v60 }
 0x2b6   : > { %v1783_v4 = vpop.eup %1782  ;;  %1065 = vst [vmem:[#allocation2 + $0x10] sm:$0xff] %v1057_v61  ;;  %1081 = vst [vmem:[#allocation3 + $0x20] sm:$0xff] %v1073_v63 }
 0x2b7   : > { %1138 = vst [vmem:[#allocation4 + $0x8] sm:$0xff] %v1781_v1  ;;  %v1785_v7 = vpop.eup %1784  ;;  %1798 = vrcp.f32 %v1036_v3 }
 0x2b8   : > { %v1787_v6 = vpop.eup %1786  ;;  %1141 = vst [vmem:[#allocation4] sm:$0xff] %v1785_v7  ;;  %1800 = vtanh.f32 %v889_v12 }
 0x2b9   : > { %v1789_v8 = vpop.eup %1788  ;;  %v1058_v5 = vmul.f32 %v1787_v6, %v1783_v4  ;;  %v1074_v9 = vsub.f32 1.0, %v1787_v6 }
 0x2ba   : > { %v1791_v10 = vpop.eup %1790  ;;  %v1037_v11 = vadd.f32 1.0, %v1789_v8 }
 0x2bb   : > { %v1793_v13 = vpop.eup %1792  ;;  %1066 = vst [vmem:[#allocation2 + $0x8] sm:$0xff] %v1058_v5  ;;  %1082 = vst [vmem:[#allocation3 + $0x28] sm:$0xff] %v1074_v9  ;;  %v1116_v15 = vadd.f32 1.0, %v1791_v10 }
 0x2bc   : > { %v1795_v16 = vpop.eup %1794  ;;  %1802 = vrcp.f32 %v1037_v11 }
 0x2bd   : > { %v1059_v18 = vmul.f32 %v1795_v16, %v1793_v13  ;;  %v1075_v21 = vsub.f32 1.0, %v1795_v16  ;;  %1804 = vrcp.f32 %v1116_v15  ;;  %v1797_v27 = vpop.eup %1796 }
 0x2bf   : > { %1067 = vst [vmem:[#allocation2 + $0x20] sm:$0xff] %v1059_v18  ;;  %1083 = vst [vmem:[#allocation3 + $0x8] sm:$0xff] %v1075_v21 }
 0x2c4   : > { %v1799_v19 = vpop.eup %1798 }
 0x2c5   : > { %v1060_v22 = vmul.f32 %v1799_v19, %v1797_v27  ;;  %v1076_v23 = vsub.f32 1.0, %v1799_v19  ;;  %v1801_v20 = vpop.eup %1800 }
 0x2c7   : > { %1068 = vst [vmem:[#allocation2 + $0x28] sm:$0xff] %v1060_v22  ;;  %1084 = vst [vmem:[#allocation3 + $0x30] sm:$0xff] %v1076_v23 }
 0x2c9   : > { %v1803_v24 = vpop.eup %1802 }
 0x2ca   : > { %v1805_v25 = vpop.eup %1804  ;;  %v1061_v26 = vmul.f32 %v1803_v24, %v1801_v20  ;;  %v1077_v28 = vsub.f32 1.0, %v1803_v24 }
 0x2cb   : > { %1140 = vst [vmem:[#allocation4 + $0x18] sm:$0xff] %v1805_v25 }
 0x2cc   : > { %1069 = vst [vmem:[#allocation2 + $0x38] sm:$0xff] %v1061_v26  ;;  %1085 = vst [vmem:[#allocation3 + $0x38] sm:$0xff] %v1077_v28 }
 0x2cd PF: > { %v1142_v29 = vld [vmem:[#allocation2 + $0x30] sm:$0xff]  ;;  %v1143_v30 = vld [vmem:[#allocation3] sm:$0xff]  ;;  %v1203_v62 = vld [vmem:[#allocation4 + $0x28] sm:$0xff]  ;;  %s1423_s5 = sshll.u32 %s2105_s28, 7  ;;  %s1263_s14 = sshll.u32 %s2207_s25, 4  ;;  %s2421_s14 = int_to_ptr.vmem [resolvable:$true] %s1263_s14 }
 0x2ce   : > { %v1144_v31 = vmul.f32 0.0, %v1143_v30  ;;  %v1150_v32 = vld [vmem:[#allocation3 + $0x18] sm:$0xff]  ;;  %v1148_v2 = vld [vmem:[#allocation2] sm:$0xff]  ;;  %v1158_v37 = vld [vmem:[#allocation3 + $0x10] sm:$0xff]  ;;  %s1995_s20 = smov [#allocation12]   ;;  %s2419_s13 = scalar_lea.hbm %s2485_s4, %s1423_s5 }
 0x2cf   : > { %v1204_v36 = vld [vmem:[#allocation4 + $0x20] sm:$0xff]  ;;  %v1156_v38 = vld [vmem:[#allocation2 + $0x18] sm:$0xff]  ;;  %v1164_v43 = vld [vmem:[#allocation2 + $0x10] sm:$0xff]  ;;  %s1247_s23 = sshll.u32 %s1995_s20, 4  ;;  %s1237_s24 = scalar_lea.sflag [#allocation14], %s2194_s9  ;;  %s2424_s23 = int_to_ptr.vmem [resolvable:$true] %s1247_s23 }
 0x2d0   : > { %v1145_v33 = vadd.f32 %v1144_v31, %v1142_v29  ;;  %v1205_v41 = vld [vmem:[#allocation4 + $0x38] sm:$0xff]  ;;  %v1166_v42 = vld [vmem:[#allocation3 + $0x20] sm:$0xff]  ;;  %v1206_v45 = vld [vmem:[#allocation4 + $0x10] sm:$0xff]  ;;  %s1888_s29 = scalar_lea.vmem %s2421_s14, 128  ;;  %p2505_p11 = scmp.ne.s32.totalorder %s2495_s30, 0 }
 0x2d1   : > { %v1174_v46 = vld [vmem:[#allocation3 + $0x28] sm:$0xff]  ;;  %v1180_v54 = vld [vmem:[#allocation2 + $0x20] sm:$0xff]  ;;  %v1208_v58 = vld [vmem:[#allocation4 + $0x30] sm:$0xff]  ;;  %p1889_p5 = scmp.ne.s32.totalorder %s2421_s14, %s1888_s29  ;;  %s1996_s1 = smov [#allocation13]  }
 0x2d2   : > { %v1219_v34 = vmul.f32 %v1203_v62, %v1145_v33  ;;  %v1151_v35 = vmul.f32 %v1150_v32, %v1145_v33  ;;  %v1172_v48 = vld [vmem:[#allocation2 + $0x8] sm:$0xff]  ;;  %v1190_v55 = vld [vmem:[#allocation3 + $0x30] sm:$0xff]  ;;  %v1209_v1 = vld [vmem:[#allocation4 + $0x18] sm:$0xff]  ;;  %s1892_s26 = sshll.u32 %s1996_s1, 4  ;;  %s1893_s26 = int_to_ptr.vmem [resolvable:$false] %s1892_s26 }
 0x2d3   : > { %v1207_v51 = vld [vmem:[#allocation4 + $0x8] sm:$0xff]  ;;  %v1198_v3 = vld [vmem:[#allocation3 + $0x38] sm:$0xff]  ;;  %v1210_v8 = vld [vmem:[#allocation4] sm:$0xff]  ;;  %p1890_p7 = pnand %p1889_p5, %p2505_p11  ;;  %s1894_s11 = scalar_lea.vmem %s1893_s26, 256 }
 0x2d4   : > { %1227 = vst [vmem:[#allocation12] sm:$0xff] %v1219_v34  ;;  %v1152_v0 = vadd.f32 %v1151_v35, %v1148_v2  ;;  %v1182_v52 = vld [vmem:[#allocation3 + $0x8] sm:$0xff]  ;;  %v1196_v7 = vld [vmem:[#allocation2 + $0x38] sm:$0xff]  ;;  %p1895_p0 = scmp.lt.s32.totalorder %s2421_s14, %s1893_s26  ;;  %p1896_p3 = scmp.lt.s32.totalorder %s1894_s11, %s1888_s29 }
 0x2d5   : > { %v1188_v60 = vld [vmem:[#allocation2 + $0x28] sm:$0xff]  ;;  %p1891_p8 = pneg %p1890_p7 }
 0x2d6   : > { %v1220_v39 = vmul.f32 %v1204_v36, %v1152_v0  ;;  %v1159_v40 = vmul.f32 %v1158_v37, %v1152_v0  ;;  %p1897_p13 = por %p1896_p3, %p1895_p0 }
 0x2d8   : > { %1228 = vst [vmem:[#allocation12 + $0x8] sm:$0xff] %v1220_v39  ;;  %v1160_v14 = vadd.f32 %v1159_v40, %v1156_v38  ;;  %p1898_p2 = pnand %p1897_p13, %p1891_p8 }
 0x2da   : > { %v1221_v44 = vmul.f32 %v1205_v41, %v1160_v14  ;;  %v1167_v17 = vmul.f32 %v1166_v42, %v1160_v14 }
 0x2dc   : > { %1229 = vst [vmem:[#allocation12 + $0x10] sm:$0xff] %v1221_v44  ;;  %v1168_v47 = vadd.f32 %v1167_v17, %v1164_v43 }
 0x2de   : > { %v1222_v49 = vmul.f32 %v1206_v45, %v1168_v47  ;;  %v1175_v50 = vmul.f32 %v1174_v46, %v1168_v47 }
 0x2e0   : > { %1230 = vst [vmem:[#allocation12 + $0x18] sm:$0xff] %v1222_v49  ;;  %v1176_v53 = vadd.f32 %v1175_v50, %v1172_v48 }
 0x2e2   : > { %v1223_v56 = vmul.f32 %v1207_v51, %v1176_v53  ;;  %v1183_v57 = vmul.f32 %v1182_v52, %v1176_v53 }
 0x2e4   : > { %1231 = vst [vmem:[#allocation12 + $0x20] sm:$0xff] %v1223_v56  ;;  %v1184_v59 = vadd.f32 %v1183_v57, %v1180_v54 }
 0x2e6   : > { %v1224_v61 = vmul.f32 %v1208_v58, %v1184_v59  ;;  %v1191_v63 = vmul.f32 %v1190_v55, %v1184_v59 }
 0x2e8   : > { %1232 = vst [vmem:[#allocation12 + $0x28] sm:$0xff] %v1224_v61  ;;  %v1192_v4 = vadd.f32 %v1191_v63, %v1188_v60 }
 0x2ea   : > { %v1225_v12 = vmul.f32 %v1209_v1, %v1192_v4  ;;  %v1199_v6 = vmul.f32 %v1198_v3, %v1192_v4 }
 0x2ec   : > { %1233 = vst [vmem:[#allocation12 + $0x30] sm:$0xff] %v1225_v12  ;;  %v1200_v5 = vadd.f32 %v1199_v6, %v1196_v7 }
 0x2ee   : > { %v1226_v9 = vmul.f32 %v1210_v8, %v1200_v5  ;;  %1235 = vst [vmem:[%s2207_s25] sm:$0xff] %v1200_v5 }
 0x2ef   : > { %1901 = shalt.err (!%p1898_p2)
}
 0x2f0   : > { %s1902_s12 = scalar_lea.hbm %s2419_s13, 128  ;;  %s1906_s8 = scalar_lea.hbm %s2485_s4, 256 }
 0x2f1   : > { %p1903_p10 = scmp.ne.s32.totalorder %s2419_s13, %s1902_s12  ;;  %p1907_p6 = scmp.lt.s32.totalorder %s2419_s13, %s2485_s4 }
 0x2f2   : > { %p1908_p1 = scmp.lt.s32.totalorder %s1906_s8, %s1902_s12 }
 0x2f3   : > { %p1904_p12 = pnand %p1903_p10, %p2505_p11 }
 0x2f4   : > { %p1909_p4 = por %p1908_p1, %p1907_p6 }
 0x2f5   : > { %p1905_p9 = pneg %p1904_p12 }
 0x2f7   : > { %p1910_p5 = pnand %p1909_p4, %p1905_p9 }
 0x2f9   : > { %1913 = shalt.err (!%p1910_p5)
}
 0x2fa   : > { %1579 = dma.vmem_to_hbm [thread:$0]  (%p2505_p11), %s2421_s14, 128, %s2419_s13, %s1237_s24   ;;  %1234 = vst [vmem:[#allocation12 + $0x38] sm:$0xff] %v1226_v9 }
 0x2fb   : > { %s1914_s5 = scalar_lea.vmem %s2424_s23, 1024  ;;  %p2506_p8 = scmp.eq.s32.totalorder %s2105_s28, 1 }
 0x2fc   : > { %p1915_p7 = scmp.ne.s32.totalorder %s2424_s23, %s1914_s5  ;;  %p1921_p13 = scmp.lt.s32.totalorder %s2424_s23, %s2424_s23 }
 0x2fd   : > { %p1922_p2 = scmp.lt.s32.totalorder %s1914_s5, %s1914_s5 }
 0x2fe   : > { %p1916_p0 = pnand %p1915_p7, %p2506_p8 }
 0x2ff   : > { %p1923_p10 = por %p1922_p2, %p1921_p13 }
 0x300   : > { %p1917_p3 = pneg %p1916_p0 }
 0x302   : > { %p1924_p12 = pnand %p1923_p10, %p1917_p3 }
 0x304   : > { %1927 = shalt.err (!%p1924_p12)
}
 0x305   : > { %s1997_s30 = smov 128   ;;  %s1998_s20 = smov 8  }
 0x306   : > { %p2507_p9 = pmov %p2506_p8  ;;  %p2508_p11 = pmov %p2506_p8 }
 0x308   : > { %1578 = dma.vmem_to_hbm [thread:$0]  (%p2507_p9), %s2424_s23, 1024, %s2484_s3, [#allocation8], %s1997_s30, %s1997_s30, %s1998_s20  }
 0x309   : > { %1963 = dma.done.wait (%p2508_p11), [#allocation8], 1024   ;;  %p2509_p6 = pmov %p2506_p8 }
 0x30b   : > { %1965 = vsyncadd (%p2509_p6), [#allocation8], 4294966272 }
 0x30c PF: > { %s1279_s10 = sand.u32 1, %s1972_s15   ;;  %p2510_p1 = scmp.ne.s32.totalorder %s2496_s6, 0 }
 0x30d   : > { %p2511_p4 = scmp.ge.s32.totalorder %s1984_s18, 2  ;;  %s1280_s13 = scalar_lea.sflag [#allocation14], %s1279_s10 }
 0x30f   : > { %p1595_p5 = pnand %p2511_p4, %p2510_p1 }
 0x311   : > { %p1596_p7 = pneg %p1595_p5 }
 0x313   : > { %1967 = dma.done.wait (%p1596_p7), %s1280_s13, 128  }
 0x314   : > { %1969 = vsyncadd (%p1596_p7), %s1280_s13, 4294967168  ;;  %p20_p8 = scmp.ge.s32.totalorder %s2045_s19, 4   ;;  %s2512_s15 = smov %s1976_s16 }
 0x315   : > { %s2513_s16 = smov %s1980_s17  ;;  %s2514_s17 = smov %s2056_s22 }
 0x316   : > { %s2515_s18 = smov %s2045_s19  ;;  %22 = sbr.rel (!%p20_p8) target bundleno = 9 (0x9), region = 131 }
 0x31b   :  { %1285 = vsyncpa [#allocation7], 1 }
 0x31c   :  { %1287 = vsyncpa [#allocation7 + $0x1], 1 }
 0x31d   :  { %1288 = vsyncpa [#allocation10], 1 }
 0x31e   :  { %1290 = vsyncpa [#allocation10 + $0x1], 1 }
 0x31f   :  { %1291 = vsyncpa [#allocation8], 1 }
 0x320   :  { %1293 = vsyncpa [#allocation8 + $0x1], 1 }
 0x321   :  { %1294 = vsyncpa [#allocation14], 1 }
 0x322   :  { %1296 = vsyncpa [#allocation14 + $0x1], 1 }

</bundles_post_ra>
